<compile_context>
chip_gen: v5e
topology: v5e:2x2
jax: 0.10.0
libtpu: 0.0.40
codegen_flags: <defaults>
</compile_context>

<pallas_src>
import functools

import jax
import jax.numpy as jnp
from jax import lax
from jax.experimental import pallas as pl
from jax.experimental.pallas import tpu as pltpu

BN_EPS = 1e-5

# Rows of the persistent (8, H) f32 VMEM scratch.
_SUM1, _SQ1, _SUM2, _SQ2, _SC1, _SH1, _SC2, _SH2 = range(8)


def _row(ref, r):
    return ref[r : r + 1, :]


def _disc_kernel(
    x_ref, w1_ref, g1_ref, be1_ref, w2_ref, g2_ref, be2_ref, w3_ref, b3_ref,
    out_ref, st_ref, *, n_true, n_pad, tile_n,
):
    phase = pl.program_id(0)  # 0: BN1 stats, 1: BN2 stats, 2: emit output
    tile = pl.program_id(1)
    inv_n = 1.0 / float(n_true)

    if n_pad != n_true:
        rows = tile * tile_n + lax.broadcasted_iota(jnp.int32, (tile_n, 1), 0)
        valid = (rows < n_true).astype(jnp.float32)
        mask = lambda v: v * valid
    else:
        mask = lambda v: v

    # ---- Linear 1 (bias cancelled by the following BatchNorm) --------------
    h1 = jnp.dot(
        x_ref[...].astype(jnp.bfloat16), w1_ref[...],
        preferred_element_type=jnp.float32,
    )

    # ---- phase 0: accumulate BN1 sum / sum-of-squares over the full batch --
    @pl.when(phase == 0)
    def _():
        @pl.when(tile == 0)
        def _():
            st_ref[...] = jnp.zeros_like(st_ref)

        hm = mask(h1)
        st_ref[_SUM1:_SUM1 + 1, :] += jnp.sum(hm, axis=0, keepdims=True)
        st_ref[_SQ1:_SQ1 + 1, :] += jnp.sum(hm * h1, axis=0, keepdims=True)

    # ---- phases 1 & 2 -------------------------------------------------------
    @pl.when(phase >= 1)
    def _():
        # Finalize BN1 affine (scale/shift) once, at the first tile of phase 1.
        @pl.when(jnp.logical_and(phase == 1, tile == 0))
        def _():
            mean = _row(st_ref, _SUM1) * inv_n
            var = jnp.maximum(_row(st_ref, _SQ1) * inv_n - mean * mean, 0.0)
            scale = g1_ref[...] * lax.rsqrt(var + BN_EPS)
            st_ref[_SC1:_SC1 + 1, :] = scale
            st_ref[_SH1:_SH1 + 1, :] = be1_ref[...] - mean * scale

        # BN1 as a single fused multiply-add, then ReLU, then Linear 2.
        a1 = jnp.maximum(h1 * _row(st_ref, _SC1) + _row(st_ref, _SH1), 0.0)
        h2 = jnp.dot(
            a1.astype(jnp.bfloat16), w2_ref[...],
            preferred_element_type=jnp.float32,
        )

        @pl.when(phase == 1)
        def _():
            hm2 = mask(h2)
            st_ref[_SUM2:_SUM2 + 1, :] += jnp.sum(hm2, axis=0, keepdims=True)
            st_ref[_SQ2:_SQ2 + 1, :] += jnp.sum(hm2 * h2, axis=0, keepdims=True)

        @pl.when(phase == 2)
        def _():
            @pl.when(tile == 0)
            def _():
                mean2 = _row(st_ref, _SUM2) * inv_n
                var2 = jnp.maximum(_row(st_ref, _SQ2) * inv_n - mean2 * mean2, 0.0)
                scale2 = g2_ref[...] * lax.rsqrt(var2 + BN_EPS)
                st_ref[_SC2:_SC2 + 1, :] = scale2
                st_ref[_SH2:_SH2 + 1, :] = be2_ref[...] - mean2 * scale2

            a2 = jnp.maximum(h2 * _row(st_ref, _SC2) + _row(st_ref, _SH2), 0.0)
            out = jnp.dot(
                a2.astype(jnp.bfloat16), w3_ref[...],
                preferred_element_type=jnp.float32,
            ) + b3_ref[...]
            out_ref[...] = out.astype(out_ref.dtype)


def _ceil_to(v, m):
    return (v + m - 1) // m * m


def discriminator_forward(x, params, *, tile_n=256):
    """x: (N, input_dim) float32. params: dict from init_params."""
    n, d_in = x.shape
    hid = params["w1"].shape[1]
    dom = params["w3"].shape[1]

    d_p = _ceil_to(d_in, 128)
    h_p = _ceil_to(hid, 128)
    dom_p = _ceil_to(dom, 128)
    tile = max(8, min(tile_n, _ceil_to(n, 8)))
    n_p = _ceil_to(n, tile)
    n_tiles = n_p // tile

    f32, bf16 = jnp.float32, jnp.bfloat16

    def pad2(a, r, c, dt):
        return jnp.pad(a, ((0, r - a.shape[0]), (0, c - a.shape[1]))).astype(dt)

    x_p = pad2(x.astype(f32), n_p, d_p, f32)
    w1 = pad2(params["w1"], d_p, h_p, bf16)
    w2 = pad2(params["w2"], h_p, h_p, bf16)
    w3 = pad2(params["w3"], h_p, dom_p, bf16)
    g1 = pad2(params["g1"], 1, h_p, f32)
    be1 = pad2(params["be1"], 1, h_p, f32)
    g2 = pad2(params["g2"], 1, h_p, f32)
    be2 = pad2(params["be2"], 1, h_p, f32)
    b3 = pad2(params["b3"], 1, dom_p, f32)
    # b1 / b2 intentionally not passed: BatchNorm's mean subtraction cancels them.

    def const(shape):
        return pl.BlockSpec(shape, lambda p, i: (0, 0))  # DMA once, VMEM-resident

    grid_spec = pltpu.PrefetchScalarGridSpec(
        num_scalar_prefetch=0,
        grid=(3, n_tiles),  # (phase, batch tile)
        in_specs=[
            pl.BlockSpec((tile, d_p), lambda p, i: (i, 0)),  # x: streamed per tile
            const((d_p, h_p)), const((1, h_p)), const((1, h_p)),
            const((h_p, h_p)), const((1, h_p)), const((1, h_p)),
            const((h_p, dom_p)), const((1, dom_p)),
        ],
        out_specs=pl.BlockSpec((tile, dom_p), lambda p, i: (i, 0)),
        scratch_shapes=[pltpu.VMEM((8, h_p), jnp.float32)],  # BN stats + affine
    )

    weight_bytes = 2 * (w1.size + w2.size + w3.size) + 4 * (5 * h_p + dom_p)
    cost = pl.CostEstimate(
        flops=int(2 * n_p * (3 * d_p * h_p + 2 * h_p * h_p + h_p * dom_p)),
        transcendentals=int(2 * h_p),
        bytes_accessed=int(3 * x_p.size * 4 + 3 * n_p * dom_p * 4 + weight_bytes),
    )

    kernel = functools.partial(_disc_kernel, n_true=n, n_pad=n_p, tile_n=tile)
    out_p = pl.pallas_call(
        kernel,
        out_shape=jax.ShapeDtypeStruct((n_p, dom_p), jnp.float32),
        grid_spec=grid_spec,
        compiler_params=pltpu.CompilerParams(
            # Both axes are sequential: BN statistics are carried across batch tiles in
            # VMEM scratch, and the phase axis enforces stats-before-apply ordering.
            # TODO(synk): shard the tile axis over v7x's 2 TensorCores with a cross-core
            #             (CMEM) stat reduction + core barrier.
            dimension_semantics=("arbitrary", "arbitrary"),
            vmem_limit_bytes=32 * 1024 * 1024,
        ),
        cost_estimate=cost,
    )(x_p, w1, g1, be1, w2, g2, be2, w3, b3)

    return out_p[:n, :dom]


def init_params(key, input_dim, hidden_dim, num_domains):
    """Deterministic PyTorch-style init. Linear weights stored transposed
    (in_features, out_features) so the kernel computes x @ W directly."""
    ks = jax.random.split(key, 6)

    def lin(kw, kb, fan_in, fan_out):
        bound = 1.0 / jnp.sqrt(fan_in)
        w = jax.random.uniform(kw, (fan_in, fan_out), jnp.float32, -bound, bound)
        b = jax.random.uniform(kb, (1, fan_out), jnp.float32, -bound, bound)
        return w, b

    w1, b1 = lin(ks[0], ks[1], input_dim, hidden_dim)
    w2, b2 = lin(ks[2], ks[3], hidden_dim, hidden_dim)
    w3, b3 = lin(ks[4], ks[5], hidden_dim, num_domains)
    return {
        "w1": w1, "b1": b1,
        "g1": jnp.ones((1, hidden_dim), jnp.float32),
        "be1": jnp.zeros((1, hidden_dim), jnp.float32),
        "w2": w2, "b2": b2,
        "g2": jnp.ones((1, hidden_dim), jnp.float32),
        "be2": jnp.zeros((1, hidden_dim), jnp.float32),
        "w3": w3, "b3": b3,
    }


def reference_forward_f32(x, p):
    """Plain-JAX f32 reference with exact PyTorch training-mode semantics."""
    def bn(h, g, be):
        mean = jnp.mean(h, axis=0, keepdims=True)
        var = jnp.mean((h - mean) ** 2, axis=0, keepdims=True)
        return (h - mean) * lax.rsqrt(var + BN_EPS) * g + be

    h = jnp.maximum(bn(x @ p["w1"] + p["b1"], p["g1"], p["be1"]), 0.0)
    h = jnp.maximum(bn(h @ p["w2"] + p["b2"], p["g2"], p["be2"]), 0.0)
    return h @ p["w3"] + p["b3"]


def reference_forward_bf16(x, p):
    """Reference that mirrors the kernel's arithmetic (bf16 MXU operands, f32 acc)."""
    def mm(a, w):
        return jnp.dot(a.astype(jnp.bfloat16), w.astype(jnp.bfloat16),
                       preferred_element_type=jnp.float32)

    def bn(h, g, be, n):
        mean = jnp.sum(h, axis=0, keepdims=True) / n
        var = jnp.maximum(jnp.sum(h * h, axis=0, keepdims=True) / n - mean * mean, 0.0)
        scale = g * lax.rsqrt(var + BN_EPS)
        return h * scale + (be - mean * scale)

    n = x.shape[0]
    h = jnp.maximum(bn(mm(x, p["w1"]), p["g1"], p["be1"], n), 0.0)
    h = jnp.maximum(bn(mm(h, p["w2"]), p["g2"], p["be2"], n), 0.0)
    return mm(h, p["w3"]) + p["b3"]


if __name__ == "__main__":
    # Module-default feature dims, small batch; tile_n=32 exercises multi-tile BN
    # accumulation and batch-padding masking (72 -> 96 padded rows).
    batch, input_dim, hidden_dim, num_domains = 72, 256, 256, 4

    key = jax.random.PRNGKey(0)
    kx, kp = jax.random.split(key)
    x = jax.random.normal(kx, (batch, input_dim), jnp.float32)
    params = init_params(kp, input_dim, hidden_dim, num_domains)

    out = discriminator_forward(x, params, tile_n=32)
    out = jax.block_until_ready(out)
    assert out.shape == (batch, num_domains)

    ref_bf16 = reference_forward_bf16(x, params)   # matches kernel arithmetic
    ref_f32 = reference_forward_f32(x, params)     # exact module semantics
    assert jnp.allclose(out, ref_bf16, atol=2e-3, rtol=2e-3), "mismatch vs bf16 reference"
    assert jnp.allclose(out, ref_f32, atol=5e-2, rtol=5e-2), "mismatch vs f32 reference"

    print("KERNEL_OK")
</pallas_src>

<mosaic_0001>
module attributes {stable_mosaic.version = 11 : i64} {
  func.func @_disc_kernel(%arg0: i32, %arg1: i32, %arg2: memref<32x256xf32, #tpu.memory_space<vmem>>, %arg3: memref<256x256xbf16, #tpu.memory_space<vmem>>, %arg4: memref<1x256xf32, #tpu.memory_space<vmem>>, %arg5: memref<1x256xf32, #tpu.memory_space<vmem>>, %arg6: memref<256x256xbf16, #tpu.memory_space<vmem>>, %arg7: memref<1x256xf32, #tpu.memory_space<vmem>>, %arg8: memref<1x256xf32, #tpu.memory_space<vmem>>, %arg9: memref<256x128xbf16, #tpu.memory_space<vmem>>, %arg10: memref<1x128xf32, #tpu.memory_space<vmem>>, %arg11: memref<32x128xf32, #tpu.memory_space<vmem>>, %arg12: memref<8x256xf32, #tpu.memory_space<vmem>>) attributes {dimension_semantics = [#tpu.dimension_semantics<arbitrary>, #tpu.dimension_semantics<arbitrary>], iteration_bounds = array<i64: 3, 3>, scalar_prefetch = 0 : i64, scratch_operands = 1 : i64, tpu.core_type = #tpu.core_type<tc>, window_params = [{transform_indices = @transform_0, window_bounds = array<i64: 32, 256>}, {pipeline_mode = #tpu.pipeline_mode<synchronous>, transform_indices = @transform_1, window_bounds = array<i64: 256, 256>}, {pipeline_mode = #tpu.pipeline_mode<synchronous>, transform_indices = @transform_2, window_bounds = array<i64: 1, 256>}, {pipeline_mode = #tpu.pipeline_mode<synchronous>, transform_indices = @transform_3, window_bounds = array<i64: 1, 256>}, {pipeline_mode = #tpu.pipeline_mode<synchronous>, transform_indices = @transform_4, window_bounds = array<i64: 256, 256>}, {pipeline_mode = #tpu.pipeline_mode<synchronous>, transform_indices = @transform_5, window_bounds = array<i64: 1, 256>}, {pipeline_mode = #tpu.pipeline_mode<synchronous>, transform_indices = @transform_6, window_bounds = array<i64: 1, 256>}, {pipeline_mode = #tpu.pipeline_mode<synchronous>, transform_indices = @transform_7, window_bounds = array<i64: 256, 128>}, {pipeline_mode = #tpu.pipeline_mode<synchronous>, transform_indices = @transform_8, window_bounds = array<i64: 1, 128>}, {transform_indices = @transform_9, window_bounds = array<i64: 32, 128>}]} {
    %c32_i32 = arith.constant 32 : i32
    %0 = arith.muli %arg1, %c32_i32 : i32
    %1 = tpu.iota {dimensions = array<i32: 0>} : vector<32x1xi32>
    %2 = vector.broadcast %0 : i32 to vector<32x1xi32>
    %3 = arith.addi %2, %1 : vector<32x1xi32>
    %c72_i32 = arith.constant 72 : i32
    %4 = vector.broadcast %c72_i32 : i32 to vector<32x1xi32>
    %5 = arith.cmpi slt, %3, %4 : vector<32x1xi32>
    %6 = arith.extui %5 : vector<32x1xi1> to vector<32x1xi32>
    %7 = arith.sitofp %6 : vector<32x1xi32> to vector<32x1xf32>
    %c0 = arith.constant 0 : index
    %c0_0 = arith.constant 0 : index
    %8 = vector.load %arg2[%c0, %c0_0] : memref<32x256xf32, #tpu.memory_space<vmem>>, vector<32x256xf32>
    %9 = arith.truncf %8 : vector<32x256xf32> to vector<32x256xbf16>
    %c0_1 = arith.constant 0 : index
    %c0_2 = arith.constant 0 : index
    %10 = vector.load %arg3[%c0_1, %c0_2] : memref<256x256xbf16, #tpu.memory_space<vmem>>, vector<256x256xbf16>
    %cst = arith.constant dense<0.000000e+00> : vector<32x256xf32>
    %11 = tpu.matmul %9, %10, %cst {dimension_numbers = #tpu.dot_dimension_numbers<[1], [0], [0], [1], [0, 0, 1, 1], [], []>} : vector<32x256xbf16>, vector<256x256xbf16>, vector<32x256xf32> -> vector<32x256xf32>
    %c0_i32 = arith.constant 0 : i32
    %12 = arith.cmpi eq, %arg0, %c0_i32 : i32
    %13 = arith.extui %12 : i1 to i32
    %c0_i32_3 = arith.constant 0 : i32
    %14 = arith.cmpi ne, %13, %c0_i32_3 : i32
    scf.if %14 {
      %c0_i32_5 = arith.constant 0 : i32
      %18 = arith.cmpi eq, %arg1, %c0_i32_5 : i32
      %19 = arith.extui %18 : i1 to i32
      %c0_i32_6 = arith.constant 0 : i32
      %20 = arith.cmpi ne, %19, %c0_i32_6 : i32
      scf.if %20 {
        %cst_16 = arith.constant 0.000000e+00 : f32
        %34 = vector.broadcast %cst_16 : f32 to vector<8x256xf32>
        %c0_17 = arith.constant 0 : index
        %c0_18 = arith.constant 0 : index
        %35 = vector.load %arg12[%c0_17, %c0_18] : memref<8x256xf32, #tpu.memory_space<vmem>>, vector<8x256xf32>
        tpu.vector_store %arg12[%c0_17, %c0_18], %34 {strides = array<i32>} : memref<8x256xf32, #tpu.memory_space<vmem>>, vector<8x256xf32>,
      } else {
      }
      %21 = vector.broadcast %7 : vector<32x1xf32> to vector<32x256xf32>
      %22 = arith.mulf %11, %21 : vector<32x256xf32>
      %c0_7 = arith.constant 0 : index
      %c0_8 = arith.constant 0 : index
      %23 = vector.load %arg12[%c0_7, %c0_8] : memref<8x256xf32, #tpu.memory_space<vmem>>, vector<1x256xf32>
      %cst_9 = arith.constant dense<0.000000e+00> : vector<256xf32>
      %24 = vector.multi_reduction <add>, %22, %cst_9 [0] : vector<32x256xf32> to vector<256xf32>
      %25 = vector.shape_cast %24 : vector<256xf32> to vector<1x256xf32>
      %26 = arith.addf %23, %25 : vector<1x256xf32>
      %c0_10 = arith.constant 0 : index
      %c0_11 = arith.constant 0 : index
      %27 = vector.load %arg12[%c0_10, %c0_11] : memref<8x256xf32, #tpu.memory_space<vmem>>, vector<1x256xf32>
      tpu.vector_store %arg12[%c0_10, %c0_11], %26 {strides = array<i32>} : memref<8x256xf32, #tpu.memory_space<vmem>>, vector<1x256xf32>,
      %c1 = arith.constant 1 : index
      %c0_12 = arith.constant 0 : index
      %28 = vector.load %arg12[%c1, %c0_12] : memref<8x256xf32, #tpu.memory_space<vmem>>, vector<1x256xf32>
      %29 = arith.mulf %22, %11 : vector<32x256xf32>
      %cst_13 = arith.constant dense<0.000000e+00> : vector<256xf32>
      %30 = vector.multi_reduction <add>, %29, %cst_13 [0] : vector<32x256xf32> to vector<256xf32>
      %31 = vector.shape_cast %30 : vector<256xf32> to vector<1x256xf32>
      %32 = arith.addf %28, %31 : vector<1x256xf32>
      %c1_14 = arith.constant 1 : index
      %c0_15 = arith.constant 0 : index
      %33 = vector.load %arg12[%c1_14, %c0_15] : memref<8x256xf32, #tpu.memory_space<vmem>>, vector<1x256xf32>
      tpu.vector_store %arg12[%c1_14, %c0_15], %32 {strides = array<i32>} : memref<8x256xf32, #tpu.memory_space<vmem>>, vector<1x256xf32>,
    } else {
    }
    %c1_i32 = arith.constant 1 : i32
    %15 = arith.cmpi sge, %arg0, %c1_i32 : i32
    %16 = arith.extui %15 : i1 to i32
    %c0_i32_4 = arith.constant 0 : i32
    %17 = arith.cmpi ne, %16, %c0_i32_4 : i32
    scf.if %17 {
      %c1_i32_5 = arith.constant 1 : i32
      %18 = arith.cmpi eq, %arg0, %c1_i32_5 : i32
      %c0_i32_6 = arith.constant 0 : i32
      %19 = arith.cmpi eq, %arg1, %c0_i32_6 : i32
      %20 = arith.andi %18, %19 : i1
      %21 = arith.extui %20 : i1 to i32
      %c0_i32_7 = arith.constant 0 : i32
      %22 = arith.cmpi ne, %21, %c0_i32_7 : i32
      scf.if %22 {
        %c0_17 = arith.constant 0 : index
        %c0_18 = arith.constant 0 : index
        %40 = vector.load %arg12[%c0_17, %c0_18] : memref<8x256xf32, #tpu.memory_space<vmem>>, vector<1x256xf32>
        %cst_19 = arith.constant 0.013888889 : f32
        %41 = vector.broadcast %cst_19 : f32 to vector<1x256xf32>
        %42 = arith.mulf %40, %41 : vector<1x256xf32>
        %c1 = arith.constant 1 : index
        %c0_20 = arith.constant 0 : index
        %43 = vector.load %arg12[%c1, %c0_20] : memref<8x256xf32, #tpu.memory_space<vmem>>, vector<1x256xf32>
        %cst_21 = arith.constant 0.013888889 : f32
        %44 = vector.broadcast %cst_21 : f32 to vector<1x256xf32>
        %45 = arith.mulf %43, %44 : vector<1x256xf32>
        %46 = arith.mulf %42, %42 : vector<1x256xf32>
        %47 = arith.subf %45, %46 : vector<1x256xf32>
        %cst_22 = arith.constant 0.000000e+00 : f32
        %48 = vector.broadcast %cst_22 : f32 to vector<1x256xf32>
        %49 = arith.maximumf %47, %48 : vector<1x256xf32>
        %c0_23 = arith.constant 0 : index
        %c0_24 = arith.constant 0 : index
        %50 = vector.load %arg4[%c0_23, %c0_24] : memref<1x256xf32, #tpu.memory_space<vmem>>, vector<1x256xf32>
        %cst_25 = arith.constant 9.99999974E-6 : f32
        %51 = vector.broadcast %cst_25 : f32 to vector<1x256xf32>
        %52 = arith.addf %49, %51 : vector<1x256xf32>
        %53 = math.rsqrt %52 : vector<1x256xf32>
        %54 = arith.mulf %50, %53 : vector<1x256xf32>
        %c4_26 = arith.constant 4 : index
        %c0_27 = arith.constant 0 : index
        %55 = vector.load %arg12[%c4_26, %c0_27] : memref<8x256xf32, #tpu.memory_space<vmem>>, vector<1x256xf32>
        tpu.vector_store %arg12[%c4_26, %c0_27], %54 {strides = array<i32>} : memref<8x256xf32, #tpu.memory_space<vmem>>, vector<1x256xf32>,
        %c0_28 = arith.constant 0 : index
        %c0_29 = arith.constant 0 : index
        %56 = vector.load %arg5[%c0_28, %c0_29] : memref<1x256xf32, #tpu.memory_space<vmem>>, vector<1x256xf32>
        %57 = arith.mulf %42, %54 : vector<1x256xf32>
        %58 = arith.subf %56, %57 : vector<1x256xf32>
        %c5_30 = arith.constant 5 : index
        %c0_31 = arith.constant 0 : index
        %59 = vector.load %arg12[%c5_30, %c0_31] : memref<8x256xf32, #tpu.memory_space<vmem>>, vector<1x256xf32>
        tpu.vector_store %arg12[%c5_30, %c0_31], %58 {strides = array<i32>} : memref<8x256xf32, #tpu.memory_space<vmem>>, vector<1x256xf32>,
      } else {
      }
      %c4 = arith.constant 4 : index
      %c0_8 = arith.constant 0 : index
      %23 = vector.load %arg12[%c4, %c0_8] : memref<8x256xf32, #tpu.memory_space<vmem>>, vector<1x256xf32>
      %24 = vector.broadcast %23 : vector<1x256xf32> to vector<32x256xf32>
      %25 = arith.mulf %11, %24 : vector<32x256xf32>
      %c5 = arith.constant 5 : index
      %c0_9 = arith.constant 0 : index
      %26 = vector.load %arg12[%c5, %c0_9] : memref<8x256xf32, #tpu.memory_space<vmem>>, vector<1x256xf32>
      %27 = vector.broadcast %26 : vector<1x256xf32> to vector<32x256xf32>
      %28 = arith.addf %25, %27 : vector<32x256xf32>
      %cst_10 = arith.constant 0.000000e+00 : f32
      %29 = vector.broadcast %cst_10 : f32 to vector<32x256xf32>
      %30 = arith.maximumf %28, %29 : vector<32x256xf32>
      %31 = arith.truncf %30 : vector<32x256xf32> to vector<32x256xbf16>
      %c0_11 = arith.constant 0 : index
      %c0_12 = arith.constant 0 : index
      %32 = vector.load %arg6[%c0_11, %c0_12] : memref<256x256xbf16, #tpu.memory_space<vmem>>, vector<256x256xbf16>
      %cst_13 = arith.constant dense<0.000000e+00> : vector<32x256xf32>
      %33 = tpu.matmul %31, %32, %cst_13 {dimension_numbers = #tpu.dot_dimension_numbers<[1], [0], [0], [1], [0, 0, 1, 1], [], []>} : vector<32x256xbf16>, vector<256x256xbf16>, vector<32x256xf32> -> vector<32x256xf32>
      %c1_i32_14 = arith.constant 1 : i32
      %34 = arith.cmpi eq, %arg0, %c1_i32_14 : i32
      %35 = arith.extui %34 : i1 to i32
      %c0_i32_15 = arith.constant 0 : i32
      %36 = arith.cmpi ne, %35, %c0_i32_15 : i32
      scf.if %36 {
        %40 = vector.broadcast %7 : vector<32x1xf32> to vector<32x256xf32>
        %41 = arith.mulf %33, %40 : vector<32x256xf32>
        %c2 = arith.constant 2 : index
        %c0_17 = arith.constant 0 : index
        %42 = vector.load %arg12[%c2, %c0_17] : memref<8x256xf32, #tpu.memory_space<vmem>>, vector<1x256xf32>
        %cst_18 = arith.constant dense<0.000000e+00> : vector<256xf32>
        %43 = vector.multi_reduction <add>, %41, %cst_18 [0] : vector<32x256xf32> to vector<256xf32>
        %44 = vector.shape_cast %43 : vector<256xf32> to vector<1x256xf32>
        %45 = arith.addf %42, %44 : vector<1x256xf32>
        %c2_19 = arith.constant 2 : index
        %c0_20 = arith.constant 0 : index
        %46 = vector.load %arg12[%c2_19, %c0_20] : memref<8x256xf32, #tpu.memory_space<vmem>>, vector<1x256xf32>
        tpu.vector_store %arg12[%c2_19, %c0_20], %45 {strides = array<i32>} : memref<8x256xf32, #tpu.memory_space<vmem>>, vector<1x256xf32>,
        %c3 = arith.constant 3 : index
        %c0_21 = arith.constant 0 : index
        %47 = vector.load %arg12[%c3, %c0_21] : memref<8x256xf32, #tpu.memory_space<vmem>>, vector<1x256xf32>
        %48 = arith.mulf %41, %33 : vector<32x256xf32>
        %cst_22 = arith.constant dense<0.000000e+00> : vector<256xf32>
        %49 = vector.multi_reduction <add>, %48, %cst_22 [0] : vector<32x256xf32> to vector<256xf32>
        %50 = vector.shape_cast %49 : vector<256xf32> to vector<1x256xf32>
        %51 = arith.addf %47, %50 : vector<1x256xf32>
        %c3_23 = arith.constant 3 : index
        %c0_24 = arith.constant 0 : index
        %52 = vector.load %arg12[%c3_23, %c0_24] : memref<8x256xf32, #tpu.memory_space<vmem>>, vector<1x256xf32>
        tpu.vector_store %arg12[%c3_23, %c0_24], %51 {strides = array<i32>} : memref<8x256xf32, #tpu.memory_space<vmem>>, vector<1x256xf32>,
      } else {
      }
      %c2_i32 = arith.constant 2 : i32
      %37 = arith.cmpi eq, %arg0, %c2_i32 : i32
      %38 = arith.extui %37 : i1 to i32
      %c0_i32_16 = arith.constant 0 : i32
      %39 = arith.cmpi ne, %38, %c0_i32_16 : i32
      scf.if %39 {
        %c0_i32_17 = arith.constant 0 : i32
        %40 = arith.cmpi eq, %arg1, %c0_i32_17 : i32
        %41 = arith.extui %40 : i1 to i32
        %c0_i32_18 = arith.constant 0 : i32
        %42 = arith.cmpi ne, %41, %c0_i32_18 : i32
        scf.if %42 {
          %c2 = arith.constant 2 : index
          %c0_29 = arith.constant 0 : index
          %58 = vector.load %arg12[%c2, %c0_29] : memref<8x256xf32, #tpu.memory_space<vmem>>, vector<1x256xf32>
          %cst_30 = arith.constant 0.013888889 : f32
          %59 = vector.broadcast %cst_30 : f32 to vector<1x256xf32>
          %60 = arith.mulf %58, %59 : vector<1x256xf32>
          %c3 = arith.constant 3 : index
          %c0_31 = arith.constant 0 : index
          %61 = vector.load %arg12[%c3, %c0_31] : memref<8x256xf32, #tpu.memory_space<vmem>>, vector<1x256xf32>
          %cst_32 = arith.constant 0.013888889 : f32
          %62 = vector.broadcast %cst_32 : f32 to vector<1x256xf32>
          %63 = arith.mulf %61, %62 : vector<1x256xf32>
          %64 = arith.mulf %60, %60 : vector<1x256xf32>
          %65 = arith.subf %63, %64 : vector<1x256xf32>
          %cst_33 = arith.constant 0.000000e+00 : f32
          %66 = vector.broadcast %cst_33 : f32 to vector<1x256xf32>
          %67 = arith.maximumf %65, %66 : vector<1x256xf32>
          %c0_34 = arith.constant 0 : index
          %c0_35 = arith.constant 0 : index
          %68 = vector.load %arg7[%c0_34, %c0_35] : memref<1x256xf32, #tpu.memory_space<vmem>>, vector<1x256xf32>
          %cst_36 = arith.constant 9.99999974E-6 : f32
          %69 = vector.broadcast %cst_36 : f32 to vector<1x256xf32>
          %70 = arith.addf %67, %69 : vector<1x256xf32>
          %71 = math.rsqrt %70 : vector<1x256xf32>
          %72 = arith.mulf %68, %71 : vector<1x256xf32>
          %c6_37 = arith.constant 6 : index
          %c0_38 = arith.constant 0 : index
          %73 = vector.load %arg12[%c6_37, %c0_38] : memref<8x256xf32, #tpu.memory_space<vmem>>, vector<1x256xf32>
          tpu.vector_store %arg12[%c6_37, %c0_38], %72 {strides = array<i32>} : memref<8x256xf32, #tpu.memory_space<vmem>>, vector<1x256xf32>,
          %c0_39 = arith.constant 0 : index
          %c0_40 = arith.constant 0 : index
          %74 = vector.load %arg8[%c0_39, %c0_40] : memref<1x256xf32, #tpu.memory_space<vmem>>, vector<1x256xf32>
          %75 = arith.mulf %60, %72 : vector<1x256xf32>
          %76 = arith.subf %74, %75 : vector<1x256xf32>
          %c7_41 = arith.constant 7 : index
          %c0_42 = arith.constant 0 : index
          %77 = vector.load %arg12[%c7_41, %c0_42] : memref<8x256xf32, #tpu.memory_space<vmem>>, vector<1x256xf32>
          tpu.vector_store %arg12[%c7_41, %c0_42], %76 {strides = array<i32>} : memref<8x256xf32, #tpu.memory_space<vmem>>, vector<1x256xf32>,
        } else {
        }
        %c6 = arith.constant 6 : index
        %c0_19 = arith.constant 0 : index
        %43 = vector.load %arg12[%c6, %c0_19] : memref<8x256xf32, #tpu.memory_space<vmem>>, vector<1x256xf32>
        %44 = vector.broadcast %43 : vector<1x256xf32> to vector<32x256xf32>
        %45 = arith.mulf %33, %44 : vector<32x256xf32>
        %c7 = arith.constant 7 : index
        %c0_20 = arith.constant 0 : index
        %46 = vector.load %arg12[%c7, %c0_20] : memref<8x256xf32, #tpu.memory_space<vmem>>, vector<1x256xf32>
        %47 = vector.broadcast %46 : vector<1x256xf32> to vector<32x256xf32>
        %48 = arith.addf %45, %47 : vector<32x256xf32>
        %cst_21 = arith.constant 0.000000e+00 : f32
        %49 = vector.broadcast %cst_21 : f32 to vector<32x256xf32>
        %50 = arith.maximumf %48, %49 : vector<32x256xf32>
        %51 = arith.truncf %50 : vector<32x256xf32> to vector<32x256xbf16>
        %c0_22 = arith.constant 0 : index
        %c0_23 = arith.constant 0 : index
        %52 = vector.load %arg9[%c0_22, %c0_23] : memref<256x128xbf16, #tpu.memory_space<vmem>>, vector<256x128xbf16>
        %cst_24 = arith.constant dense<0.000000e+00> : vector<32x128xf32>
        %53 = tpu.matmul %51, %52, %cst_24 {dimension_numbers = #tpu.dot_dimension_numbers<[1], [0], [0], [1], [0, 0, 1, 1], [], []>} : vector<32x256xbf16>, vector<256x128xbf16>, vector<32x128xf32> -> vector<32x128xf32>
        %c0_25 = arith.constant 0 : index
        %c0_26 = arith.constant 0 : index
        %54 = vector.load %arg10[%c0_25, %c0_26] : memref<1x128xf32, #tpu.memory_space<vmem>>, vector<1x128xf32>
        %55 = vector.broadcast %54 : vector<1x128xf32> to vector<32x128xf32>
        %56 = arith.addf %53, %55 : vector<32x128xf32>
        %c0_27 = arith.constant 0 : index
        %c0_28 = arith.constant 0 : index
        %57 = vector.load %arg11[%c0_27, %c0_28] : memref<32x128xf32, #tpu.memory_space<vmem>>, vector<32x128xf32>
        tpu.vector_store %arg11[%c0_27, %c0_28], %56 {strides = array<i32>} : memref<32x128xf32, #tpu.memory_space<vmem>>, vector<32x128xf32>,
      } else {
      }
    } else {
    }
    return
  }
  func.func @transform_0(%arg0: i32, %arg1: i32) -> (i32, i32) {
    %c0_i32 = arith.constant 0 : i32
    %c0_i32_0 = arith.constant 0 : i32
    return %arg1, %c0_i32 : i32, i32
  }
  func.func @transform_1(%arg0: i32, %arg1: i32) -> (i32, i32) {
    %c0_i32 = arith.constant 0 : i32
    %c0_i32_0 = arith.constant 0 : i32
    %c0_i32_1 = arith.constant 0 : i32
    return %c0_i32, %c0_i32_0 : i32, i32
  }
  func.func @transform_2(%arg0: i32, %arg1: i32) -> (i32, i32) {
    %c0_i32 = arith.constant 0 : i32
    %c0_i32_0 = arith.constant 0 : i32
    %c0_i32_1 = arith.constant 0 : i32
    return %c0_i32, %c0_i32_0 : i32, i32
  }
  func.func @transform_3(%arg0: i32, %arg1: i32) -> (i32, i32) {
    %c0_i32 = arith.constant 0 : i32
    %c0_i32_0 = arith.constant 0 : i32
    %c0_i32_1 = arith.constant 0 : i32
    return %c0_i32, %c0_i32_0 : i32, i32
  }
  func.func @transform_4(%arg0: i32, %arg1: i32) -> (i32, i32) {
    %c0_i32 = arith.constant 0 : i32
    %c0_i32_0 = arith.constant 0 : i32
    %c0_i32_1 = arith.constant 0 : i32
    return %c0_i32, %c0_i32_0 : i32, i32
  }
  func.func @transform_5(%arg0: i32, %arg1: i32) -> (i32, i32) {
    %c0_i32 = arith.constant 0 : i32
    %c0_i32_0 = arith.constant 0 : i32
    %c0_i32_1 = arith.constant 0 : i32
    return %c0_i32, %c0_i32_0 : i32, i32
  }
  func.func @transform_6(%arg0: i32, %arg1: i32) -> (i32, i32) {
    %c0_i32 = arith.constant 0 : i32
    %c0_i32_0 = arith.constant 0 : i32
    %c0_i32_1 = arith.constant 0 : i32
    return %c0_i32, %c0_i32_0 : i32, i32
  }
  func.func @transform_7(%arg0: i32, %arg1: i32) -> (i32, i32) {
    %c0_i32 = arith.constant 0 : i32
    %c0_i32_0 = arith.constant 0 : i32
    %c0_i32_1 = arith.constant 0 : i32
    return %c0_i32, %c0_i32_0 : i32, i32
  }
  func.func @transform_8(%arg0: i32, %arg1: i32) -> (i32, i32) {
    %c0_i32 = arith.constant 0 : i32
    %c0_i32_0 = arith.constant 0 : i32
    %c0_i32_1 = arith.constant 0 : i32
    return %c0_i32, %c0_i32_0 : i32, i32
  }
  func.func @transform_9(%arg0: i32, %arg1: i32) -> (i32, i32) {
    %c0_i32 = arith.constant 0 : i32
    %c0_i32_0 = arith.constant 0 : i32
    return %arg1, %c0_i32 : i32, i32
  }
}

</mosaic_0001>

<bundles_post_ra>
// kernel: tpu_custom_call.1
= control target key start
LH: loop header
LB: loop body
LE: loop exit
PB: predicated region body
PF: predicated region fallthrough
CT: control target
= control target key end

     0   :  { %s2988_s0 = inlined_call_operand.hbm [shape: f32[96,256], index: 0, kind: input, shape index: {}]   ;;  %s2989_s1 = inlined_call_operand.hbm [shape: bf16[256,256], index: 1, kind: input, shape index: {}]   ;;  %s2990_s2 = inlined_call_operand.hbm [shape: f32[1,256], index: 2, kind: input, shape index: {}]   ;;  %s2991_s3 = inlined_call_operand.vmem [shape: f32[1,256], index: 3, kind: input, shape index: {}]   ;;  %s2992_s4 = inlined_call_operand.hbm [shape: bf16[256,256], index: 4, kind: input, shape index: {}]   ;;  %s2993_s5 = inlined_call_operand.vmem [shape: f32[1,256], index: 5, kind: input, shape index: {}]   ;;  %s2994_s6 = inlined_call_operand.hbm [shape: f32[1,256], index: 6, kind: input, shape index: {}]   ;;  %s2995_s7 = inlined_call_operand.hbm [shape: bf16[256,128], index: 7, kind: input, shape index: {}]   ;;  %s2996_s8 = inlined_call_operand.vmem [shape: f32[1,128], index: 8, kind: input, shape index: {}]   ;;  %s2997_s9 = inlined_call_operand.hbm [shape: f32[96,128], index: 9, kind: output, shape index: {}]  }
   0x1   :  { %3000 = sst [smem:[#allocation21_spill]] %s2989_s1 }
   0x2   :  { %3001 = sst [smem:[#allocation22_spill]] %s2990_s2 }
   0x3   :  { %3002 = sst [smem:[#allocation23_spill]] %s2992_s4 }
   0x4   :  { %3003 = sst [smem:[#allocation24_spill]] %s2993_s5 }
   0x5   :  { %3004 = sst [smem:[#allocation25_spill]] %s2994_s6 }
   0x6   :  { %3005 = sst [smem:[#allocation26_spill]] %s2995_s7 }
   0x7   :  { %3006 = sst [smem:[#allocation27_spill]] %s2996_s8 }
   0x8   :  { %3007 = sst [smem:[#allocation28_spill]] %s2997_s9 }
   0x9   :  { %14 = vsyncpa [#allocation4], 0 }
   0xa   :  { %16 = vsyncpa [#allocation4 + $0x1], 0 }
   0xb   :  { %17 = vsyncpa [#allocation7], 0 }
   0xc   :  { %18 = vsyncpa [#allocation10], 0 }
   0xd   :  { %19 = vsyncpa [#allocation13], 0 }
   0xe   :  { %20 = vsyncpa [#allocation5], 0 }
   0xf   :  { %22 = vsyncpa [#allocation5 + $0x1], 0  ;;  %s2633_s30 = smov 0   ;;  %s2635_s10 = smov 0  }
  0x10   :  { %s2637_s11 = smov 0   ;;  %s2639_s12 = smov 0  }
  0x11   :  { %s2641_s13 = smov 0   ;;  %s2643_s14 = smov 0  }
  0x12   :  { %s2645_s15 = smov 0   ;;  %s2647_s16 = smov 0  }
  0x13 LB: > { %s2998_s17 = sadd.s32 4294967295, %s2566_s16   ;;  %p1678_p0 = scmp.ge.s32.totalorder %s2566_s16, 1  ;;  %s2566_s16 = sphi %s2647_s16, %s28_s16   ;;  %s2562_s15 = sphi %s2645_s15, %s3032_s15   ;;  %s2558_s14 = sphi %s2643_s14, %s3031_s14   ;;  %s2554_s13 = sphi %s2641_s13, %s3030_s13   ;;  %s2550_s12 = sphi %s2639_s12, %s3029_s12   ;;  %s2546_s11 = sphi %s2637_s11, %s3028_s11   ;;  %s2542_s10 = sphi %s2635_s10, %s3027_s10   ;;  %s2538_s30 = sphi %s2633_s30, %s3026_s30  }
  0x14   : > { %p2677_p1 = scmp.eq.s32.totalorder %s2998_s17, 0  ;;  %p265_p2 = scmp.lt.s32.totalorder %s2566_s16, 10 }
  0x15   : > { %s3009_s1 = sld [smem:[#allocation21_spill]]  ;;  %s2568_s23 = smov [#allocation6]  }
  0x16   : > { %p2685_p3 = pnand %p1678_p0, %p265_p2  ;;  %s278_s24 = sshll.u32 %s2568_s23, 4  ;;  %s279_s24 = int_to_ptr.vmem [resolvable:$true] %s278_s24 }
  0x17   : > { %s3012_s4 = sld [smem:[#allocation23_spill]]  ;;  %s2569_s29 = smov 128  }
  0x18   : > { %p2156_p4 = pneg %p2685_p3  ;;  %s2570_s19 = smov 8  }
  0x19   : > { %s2571_s20 = smov [#allocation9]   ;;  %s3013_s2 = sld [smem:[#allocation22_spill]] }
  0x1a   : > { %p2693_p5 = pnand %p2156_p4, %p2677_p1  ;;  %s307_s23 = sshll.u32 %s2571_s20, 4  ;;  %s308_s23 = int_to_ptr.vmem [resolvable:$true] %s307_s23 }
  0x1b   : > { %s276_s21 = sshll.u32 %s3009_s1, 4  ;;  %s3014_s6 = sld [smem:[#allocation25_spill]]  ;;  %s277_s21 = int_to_ptr.hbm [resolvable:$true] %s276_s21 }
  0x1c   : > { %2159 = dma.hbm_to_vmem [thread:$0]  (!%p2693_p5), %s277_s21, 4096, %s279_s24, [#allocation7], %s2569_s29, %s2569_s29, %s2570_s19  }
  0x1d   : > { %s305_s28 = sshll.u32 %s3012_s4, 4  ;;  %s2572_s8 = smov [#allocation8]   ;;  %s306_s28 = int_to_ptr.hbm [resolvable:$true] %s305_s28 }
  0x1e   : > { %2165 = dma.hbm_to_vmem [thread:$0]  (!%p2693_p5), %s306_s28, 4096, %s308_s23, [#allocation10], %s2569_s29, %s2569_s29, %s2570_s19  }
  0x1f   : > { %s291_s9 = sshll.u32 %s3013_s2, 4  ;;  %s293_s5 = sshll.u32 %s2572_s8, 4  ;;  %s292_s9 = int_to_ptr.hbm [resolvable:$true] %s291_s9  ;;  %s294_s5 = int_to_ptr.vmem [resolvable:$true] %s293_s5 }
  0x20   : > { %2162 = dma.hbm_to_vmem [thread:$0]  (!%p2693_p5), %s292_s9, 32, %s294_s5, [#allocation7]  }
  0x21   : > { %s323_s4 = sshll.u32 %s3014_s6, 4  ;;  %s2573_s1 = smov [#allocation11]   ;;  %s324_s4 = int_to_ptr.hbm [resolvable:$true] %s323_s4 }
  0x22   : > { %s325_s17 = sshll.u32 %s2573_s1, 4  ;;  %s3015_s7 = sld [smem:[#allocation26_spill]]  ;;  %s326_s17 = int_to_ptr.vmem [resolvable:$true] %s325_s17 }
  0x23   : > { %2168 = dma.hbm_to_vmem [thread:$0]  (!%p2693_p5), %s324_s4, 32, %s326_s17, [#allocation10]  }
  0x24   : > { %s2574_s8 = smov [#allocation12]   ;;  %s2575_s9 = smov 64  }
  0x25   : > { %s336_s5 = sshll.u32 %s2574_s8, 4  ;;  %s2576_s29 = smov 4   ;;  %s337_s5 = int_to_ptr.vmem [resolvable:$true] %s336_s5 }
  0x26   : > { %s1677_s19 = sadd.s32 4294967294, %s2566_s16   ;;  %s37_s20 = sadd.s32 1, %s2558_s14 }
  0x27   : > { %s40_s23 = sadd.s32 1, %s2562_s15  ;;  %p38_p6 = scmp.ge.s32.totalorder %s37_s20, 3 }
  0x28   : > { %s334_s28 = sshll.u32 %s3015_s7, 4  ;;  %s47_s4 = sadd.s32 1, %s2546_s11  ;;  %s335_s28 = int_to_ptr.hbm [resolvable:$true] %s334_s28 }
  0x29   : > { %2171 = dma.hbm_to_vmem [thread:$0]  (!%p2693_p5), %s335_s28, 2048, %s337_s5, [#allocation13], %s2575_s9, %s2575_s9, %s2576_s29  }
  0x2a   : > { %p54_p7 = scmp.ne.s32.totalorder %s2546_s11, %s2542_s10  ;;  %p55_p8 = scmp.eq.s32.totalorder %s2566_s16, 0 }
  0x2b   : > { %s3034_s20 = smov (%p38_p6, %s37_s20), 0  ;;  %s3036_s23 = smov (!%p38_p6, %s40_s23), %s2562_s15 }
  0x2c   : > { %s44_s25 = ssub.s32 %s2558_s14, %s3034_s20  ;;  %p2734_p9 = por %p55_p8, %p54_p7 }
  0x2d   : > { %p42_p10 = scmp.ge.s32.totalorder %s3036_s23, 3  ;;  %p45_p11 = scmp.eq.s32.totalorder %s44_s25, 0 }
  0x2e   : > { %p60_p12 = scmp.ne.s32.totalorder %s2542_s10, %s2538_s30  ;;  %s3017_s27 = sadd.s32 4294967295, %s2566_s16  }
  0x2f   : > { %p252_p13 = scmp.eq.s32.totalorder %s3017_s27, 8  ;;  %s3038_s23 = smov (%p42_p10, %s3036_s23), 0 }
  0x30   : > { %3018 = sst [smem:[#allocation20_spill]] %s3038_s23  ;;  %p2749_p0 = por %p2677_p1, %p60_p12 }
  0x31   : > { %s2745_s1 = scalar_select %p45_p11, %s2546_s11, %s47_s4  }
  0x32   : > { %p2756_p2 = por %p252_p13, %p54_p7  ;;  %p258_p4 = scmp.eq.s32.totalorder %s1677_s19, 8 }
  0x33   : > { %p2185_p5 = scmp.lt.s32.totalorder %s2566_s16, 9  ;;  %s353_s24 = sand.u32 1, %s2546_s11  }
  0x34   : > { %s2034_s28 = sshll.u32 %s2558_s14, 6  ;;  %p2763_p6 = por %p258_p4, %p60_p12 }
  0x35   : > { %s1685_s5 = sshll.u32 %s353_s24, 6  ;;  %s363_s4 = scalar_lea.hbm %s2988_s0, %s2034_s28 }
  0x36   : > { %s364_s25 = sshll.u32 %s363_s4, 4  ;;  %s357_s27 = scalar_lea.vmem [#allocation3], %s1685_s5  ;;  %s365_s25 = int_to_ptr.hbm [resolvable:$true] %s364_s25 }
  0x37   : > { %s366_s2 = sshll.u32 %s357_s27, 4  ;;  %p2173_p7 = pnand %p2185_p5, %p2734_p9  ;;  %s367_s2 = int_to_ptr.vmem [resolvable:$true] %s366_s2 }
  0x38   : > { %s354_s19 = scalar_lea.sflag [#allocation4], %s353_s24  ;;  %s2577_s6 = smov 256  }
  0x39   : > { %s2578_s7 = smov 16   ;;  %378 = sbr.rel (%p2685_p3) target bundleno = 818 (0x332), region = 56 }
  0x3a   : > { %2175 = dma.hbm_to_vmem [thread:$0]  (!%p2173_p7), %s365_s25, 1024, %s367_s2, %s354_s19, %s2577_s6, %s2577_s6, %s2578_s7  }
  0x3b   : > { %s2775_s23 = sand.u32 (!%p2685_p3), 1, %s2542_s10  }
  0x3c   : > { %s1690_s28 = sshll.u32 (!%p2685_p3), %s2775_s23, 6  ;;  %s381_s9 = scalar_lea.sflag (!%p2685_p3), [#allocation4], %s2775_s23 }
  0x3d   : > { %s2779_s5 = scalar_lea.vmem (!%p2685_p3), [#allocation3], %s1690_s28 }
  0x3e   : > { %2517 = dma.done.wait (%p2749_p0), %s381_s9, 1024  }
  0x3f   : > { %2519 = vsyncadd (%p2749_p0), %s381_s9, 4294966272 }
  0x40   : > { %2521 = dma.done.wait (%p2677_p1), [#allocation7], 4128  }
  0x41   : > { %2523 = vsyncadd (%p2677_p1), [#allocation7], 4294963168 }
  0x42   : > { %2525 = dma.done.wait (%p2677_p1), [#allocation10], 4128  }
  0x43   : > { %2527 = vsyncadd (%p2677_p1), [#allocation10], 4294963168 }
  0x44   : > { %2529 = dma.done.wait (%p2677_p1), [#allocation13], 2048  }
  0x45   : > { %2531 = vsyncadd (%p2677_p1), [#allocation13], 4294965248  ;;  %s1696_s2 = sshll.u32 %s2775_s23, 5  ;;  %s1697_s6 = sshll.u32 %s2550_s12, 5  ;;  %v448_v0 = vlaneseq  ;;  %v2579_v10 = vmov 0.0  }
  0x46   : > { %v453_v1 = vstv %s1697_s6  ;;  %v1760_v12 = vld [vmem:[#allocation6 + $0x70] sm:$0xf]  ;;  %v2050_v13 = vld [vmem:[#allocation6 + $0x74] sm:$0xf0]  ;;  %v2049_v21 = vld [vmem:[#allocation6 + $0x74] sm:$0xf] }
  0x47   : > { %v449_v2 = vshrl.u32 %v448_v0, 7  ;;  %v1761_v14 = vor.u32 %v2050_v13, %v1760_v12  ;;  %v1824_v15 = vld [vmem:[#allocation6 + $0xf0] sm:$0xf]  ;;  %v2066_v19 = vld [vmem:[#allocation6 + $0xf4] sm:$0xf0]  ;;  %s2836_s7 = scalar_lea.vmem [#allocation14], %s1696_s2 }
  0x48   : > { %v1825_v20 = vor.u32 %v2066_v19, %v1824_v15  ;;  %v1762_v22 = vld [vmem:[#allocation6 + $0x78] sm:$0xf0]  ;;  %v2065_v23 = vld [vmem:[#allocation6 + $0xf4] sm:$0xf]  ;;  %v1752_v26 = vld [vmem:[#allocation6 + $0x60] sm:$0xf] }
  0x49   : > { %v450_v3 = vadd.s32 8, %v449_v2  ;;  %v451_v4 = vadd.s32 16, %v449_v2  ;;  %v452_v5 = vadd.s32 24, %v449_v2  ;;  %v454_v6 = vadd.s32 %v453_v1, %v449_v2  ;;  %674 = vmatpush.bf16.msra.mxu0 %v1761_v14  ;;  %v1826_v25 = vld [vmem:[#allocation6 + $0xf8] sm:$0xf0]  ;;  %p1830_p1 = scmp.ne.s32.totalorder %s2554_s13, 0 }
  0x4a   : > { %v1765_v24 = vor.u32 %v2049_v21, %v1762_v22  ;;  %v2048_v27 = vld [vmem:[#allocation6 + $0x64] sm:$0xf0]  ;;  %693 = vmatpush.bf16.msra.mxu1 %v1825_v20  ;;  %v1829_v28 = vor.u32 %v2065_v23, %v1826_v25  ;;  %v1816_v30 = vld [vmem:[#allocation6 + $0xe0] sm:$0xf]  ;;  %v2047_v32 = vld [vmem:[#allocation6 + $0x64] sm:$0xf] }
  0x4b   : > { %v455_v7 = vadd.s32 %v453_v1, %v450_v3  ;;  %v456_v8 = vadd.s32 %v453_v1, %v451_v4  ;;  %v457_v9 = vadd.s32 %v453_v1, %v452_v5  ;;  %vm458_vm0 = vcmp.lt.s32.totalorder %v454_v6, 72  ;;  %v2064_v31 = vld [vmem:[#allocation6 + $0xe4] sm:$0xf0]  ;;  %v1754_v34 = vld [vmem:[#allocation6 + $0x68] sm:$0xf0]  ;;  %p1831_p3 = scmp.ne.s32.totalorder (!%p1830_p1), %s2550_s12, 0 }
  0x4c   : > { %v2802_v11 = vsel %vm458_vm0, 1.0, %v2579_v10  ;;  %v1753_v29 = vor.u32 %v2048_v27, %v1752_v26  ;;  %712 = vmatpush.bf16.msra.mxu2 %v1765_v24  ;;  %v1817_v33 = vor.u32 %v2064_v31, %v1816_v30  ;;  %v2063_v35 = vld [vmem:[#allocation6 + $0xe4] sm:$0xf]  ;;  %v1818_v36 = vld [vmem:[#allocation6 + $0xe8] sm:$0xf0]  ;;  %731 = vmatpush.bf16.msra.mxu3 %v1829_v28  ;;  %v1757_v37 = vor.u32 %v2047_v32, %v1754_v34 }
  0x4d   : > { %vm459_vm1 = vcmp.lt.s32.totalorder %v455_v7, 72  ;;  %vm460_vm2 = vcmp.lt.s32.totalorder %v456_v8, 72  ;;  %vm461_vm3 = vcmp.lt.s32.totalorder %v457_v9, 72  ;;  %v1821_v38 = vor.u32 %v2063_v35, %v1818_v36  ;;  %v1744_v39 = vld [vmem:[#allocation6 + $0x50] sm:$0xf] }
  0x4e   : > { %v2804_v16 = vsel %vm459_vm1, 1.0, %v2579_v10  ;;  %v2806_v17 = vsel %vm460_vm2, 1.0, %v2579_v10  ;;  %v2808_v18 = vsel %vm461_vm3, 1.0, %v2579_v10  ;;  %675 = vmatpush.bf16.msra.mxu0 %v1753_v29  ;;  %v2046_v40 = vld [vmem:[#allocation6 + $0x54] sm:$0xf0]  ;;  %694 = vmatpush.bf16.msra.mxu1 %v1817_v33 }
  0x4f   : > { %v1808_v41 = vld [vmem:[#allocation6 + $0xd0] sm:$0xf]  ;;  %v1745_v42 = vor.u32 %v2046_v40, %v1744_v39  ;;  %v2062_v43 = vld [vmem:[#allocation6 + $0xd4] sm:$0xf0]  ;;  %v2045_v44 = vld [vmem:[#allocation6 + $0x54] sm:$0xf] }
  0x50   : > { %v1746_v45 = vld [vmem:[#allocation6 + $0x58] sm:$0xf0]  ;;  %v1809_v46 = vor.u32 %v2062_v43, %v1808_v41  ;;  %v2061_v47 = vld [vmem:[#allocation6 + $0xd4] sm:$0xf]  ;;  %v1736_v49 = vld [vmem:[#allocation6 + $0x40] sm:$0xf]  ;;  %713 = vmatpush.bf16.msra.mxu2 %v1757_v37  ;;  %732 = vmatpush.bf16.msra.mxu3 %v1821_v38 }
  0x51   : > { %v1810_v48 = vld [vmem:[#allocation6 + $0xd8] sm:$0xf0]  ;;  %v1749_v50 = vor.u32 %v2045_v44, %v1746_v45  ;;  %v2044_v51 = vld [vmem:[#allocation6 + $0x44] sm:$0xf0]  ;;  %v1800_v52 = vld [vmem:[#allocation6 + $0xc0] sm:$0xf] }
  0x52   : > { %v2060_v53 = vld [vmem:[#allocation6 + $0xc4] sm:$0xf0]  ;;  %676 = vmatpush.bf16.msra.mxu0 %v1745_v42  ;;  %v1813_v54 = vor.u32 %v2061_v47, %v1810_v48  ;;  %v1737_v55 = vor.u32 %v2044_v51, %v1736_v49  ;;  %v2043_v56 = vld [vmem:[#allocation6 + $0x44] sm:$0xf]  ;;  %v1738_v57 = vld [vmem:[#allocation6 + $0x48] sm:$0xf0]  ;;  %695 = vmatpush.bf16.msra.mxu1 %v1809_v46 }
  0x53   : > { %v2059_v58 = vld [vmem:[#allocation6 + $0xc4] sm:$0xf]  ;;  %v1802_v59 = vld [vmem:[#allocation6 + $0xc8] sm:$0xf0]  ;;  %v1728_v60 = vld [vmem:[#allocation6 + $0x30] sm:$0xf]  ;;  %v1801_v62 = vor.u32 %v2060_v53, %v1800_v52  ;;  %v1741_v63 = vor.u32 %v2043_v56, %v1738_v57 }
  0x54   : > { %v2042_v61 = vld [vmem:[#allocation6 + $0x34] sm:$0xf0]  ;;  %714 = vmatpush.bf16.msra.mxu2 %v1749_v50  ;;  %v1792_v1 = vld [vmem:[#allocation6 + $0xb0] sm:$0xf]  ;;  %733 = vmatpush.bf16.msra.mxu3 %v1813_v54  ;;  %v1805_v3 = vor.u32 %v2059_v58, %v1802_v59  ;;  %v2041_v5 = vld [vmem:[#allocation6 + $0x34] sm:$0xf] }
  0x55   : > { %v2058_v2 = vld [vmem:[#allocation6 + $0xb4] sm:$0xf0]  ;;  %v1729_v4 = vor.u32 %v2042_v61, %v1728_v60  ;;  %v1730_v6 = vld [vmem:[#allocation6 + $0x38] sm:$0xf0]  ;;  %v2057_v7 = vld [vmem:[#allocation6 + $0xb4] sm:$0xf] }
  0x56   : > { %677 = vmatpush.bf16.msra.mxu0 %v1737_v55  ;;  %v1794_v8 = vld [vmem:[#allocation6 + $0xb8] sm:$0xf0]  ;;  %v1720_v9 = vld [vmem:[#allocation6 + $0x20] sm:$0xf]  ;;  %v2040_v10 = vld [vmem:[#allocation6 + $0x24] sm:$0xf0]  ;;  %696 = vmatpush.bf16.msra.mxu1 %v1801_v62  ;;  %v1793_v12 = vor.u32 %v2058_v2, %v1792_v1  ;;  %v1733_v13 = vor.u32 %v2041_v5, %v1730_v6 }
  0x57   : > { %v1784_v14 = vld [vmem:[#allocation6 + $0xa0] sm:$0xf]  ;;  %v2056_v15 = vld [vmem:[#allocation6 + $0xa4] sm:$0xf0]  ;;  %v1797_v19 = vor.u32 %v2057_v7, %v1794_v8  ;;  %v1721_v20 = vor.u32 %v2040_v10, %v1720_v9  ;;  %v2039_v21 = vld [vmem:[#allocation6 + $0x24] sm:$0xf] }
  0x58   : > { %715 = vmatpush.bf16.msra.mxu2 %v1741_v63  ;;  %734 = vmatpush.bf16.msra.mxu3 %v1805_v3  ;;  %v1722_v22 = vld [vmem:[#allocation6 + $0x28] sm:$0xf0]  ;;  %v2055_v23 = vld [vmem:[#allocation6 + $0xa4] sm:$0xf]  ;;  %v1712_v25 = vld [vmem:[#allocation6 + $0x10] sm:$0xf]  ;;  %v1785_v27 = vor.u32 %v2056_v15, %v1784_v14 }
  0x59   : > { %v1786_v24 = vld [vmem:[#allocation6 + $0xa8] sm:$0xf0]  ;;  %v2038_v26 = vld [vmem:[#allocation6 + $0x14] sm:$0xf0]  ;;  %v1725_v28 = vor.u32 %v2039_v21, %v1722_v22  ;;  %v1776_v29 = vld [vmem:[#allocation6 + $0x90] sm:$0xf] }
  0x5a   : > { %678 = vmatpush.bf16.msra.mxu0 %v1729_v4  ;;  %697 = vmatpush.bf16.msra.mxu1 %v1793_v12  ;;  %v2054_v30 = vld [vmem:[#allocation6 + $0x94] sm:$0xf0]  ;;  %v1789_v31 = vor.u32 %v2055_v23, %v1786_v24  ;;  %v1713_v32 = vor.u32 %v2038_v26, %v1712_v25  ;;  %v2037_v33 = vld [vmem:[#allocation6 + $0x14] sm:$0xf]  ;;  %v1714_v34 = vld [vmem:[#allocation6 + $0x18] sm:$0xf0] }
  0x5b   : > { %v2053_v35 = vld [vmem:[#allocation6 + $0x94] sm:$0xf]  ;;  %v1778_v36 = vld [vmem:[#allocation6 + $0x98] sm:$0xf0]  ;;  %v1704_v37 = vld [vmem:[#allocation6] sm:$0xf]  ;;  %v1777_v39 = vor.u32 %v2054_v30, %v1776_v29  ;;  %v1717_v40 = vor.u32 %v2037_v33, %v1714_v34 }
  0x5c   : > { %716 = vmatpush.bf16.msra.mxu2 %v1733_v13  ;;  %735 = vmatpush.bf16.msra.mxu3 %v1797_v19  ;;  %v2036_v38 = vld [vmem:[#allocation6 + $0x4] sm:$0xf0]  ;;  %v1768_v41 = vld [vmem:[#allocation6 + $0x80] sm:$0xf]  ;;  %v2035_v43 = vld [vmem:[#allocation6 + $0x4] sm:$0xf]  ;;  %v1781_v44 = vor.u32 %v2053_v35, %v1778_v36 }
  0x5d   : > { %v2052_v42 = vld [vmem:[#allocation6 + $0x84] sm:$0xf0]  ;;  %v1705_v45 = vor.u32 %v2036_v38, %v1704_v37  ;;  %v1706_v46 = vld [vmem:[#allocation6 + $0x8] sm:$0xf0]  ;;  %v470_v47 = vld [vmem:[%s2779_s5] sm:$0xff] }
  0x5e   : > { %679 = vmatpush.bf16.msra.mxu0 %v1721_v20  ;;  %698 = vmatpush.bf16.msra.mxu1 %v1785_v27  ;;  %v472_v48 = vld [vmem:[%s2779_s5 + $0x10] sm:$0xff]  ;;  %v2051_v49 = vld [vmem:[#allocation6 + $0x84] sm:$0xf]  ;;  %v1770_v50 = vld [vmem:[#allocation6 + $0x88] sm:$0xf0]  ;;  %v1769_v51 = vor.u32 %v2052_v42, %v1768_v41  ;;  %v1709_v54 = vor.u32 %v2035_v43, %v1706_v46 }
  0x5f   : > { %v471_v52 = vld [vmem:[%s2779_s5 + $0x8] sm:$0xff]  ;;  %v473_v53 = vld [vmem:[%s2779_s5 + $0x18] sm:$0xff]  ;;  %v478_v55 = vpack.c.bf16 %v472_v48, %v470_v47  ;;  %v1773_v56 = vor.u32 %v2051_v49, %v1770_v50  ;;  %v474_v58 = vld [vmem:[%s2779_s5 + $0x20] sm:$0xff] }
  0x60   : > { %717 = vmatpush.bf16.msra.mxu2 %v1725_v28  ;;  %736 = vmatpush.bf16.msra.mxu3 %v1789_v31  ;;  %v479_v57 = vpack.c.bf16 %v473_v53, %v471_v52  ;;  %v476_v59 = vld [vmem:[%s2779_s5 + $0x30] sm:$0xff]  ;;  %v475_v60 = vld [vmem:[%s2779_s5 + $0x28] sm:$0xff]  ;;  %v477_v61 = vld [vmem:[%s2779_s5 + $0x38] sm:$0xff] }
  0x61   : > { %v480_v62 = vpack.c.bf16 %v476_v59, %v474_v58  ;;  %v481_v63 = vpack.c.bf16 %v477_v61, %v475_v60 }
  0x62   : > { %680 = vmatpush.bf16.msra.mxu0 %v1713_v32  ;;  %699 = vmatpush.bf16.msra.mxu1 %v1777_v39 }
  0x64   : > { %718 = vmatpush.bf16.msra.mxu2 %v1717_v40  ;;  %737 = vmatpush.bf16.msra.mxu3 %v1781_v44 }
  0x66   : > { %681 = vmatpush.bf16.msra.mxu0 %v1705_v45  ;;  %700 = vmatpush.bf16.msra.mxu1 %v1769_v51 }
  0x68   : > { %719 = vmatpush.bf16.msra.mxu2 %v1709_v54  ;;  %738 = vmatpush.bf16.msra.mxu3 %v1773_v56 }
  0x69   : > { %682 = vmatmul.bf16.vlgmr.msra.gmra.mxu0 %v478_v55  ;;  %701 = vmatmul.bf16.vlgmr.msra.gmra.mxu1 %v479_v57 }
  0x6b   : > { %720 = vmatmul.bf16.vlgmr.msra.gmra.mxu2 %v478_v55  ;;  %739 = vmatmul.bf16.vlgmr.msra.gmra.mxu3 %v479_v57 }
  0x79   : > { %687 = vmatmul.bf16.gmra.mxu0 %v480_v62  ;;  %706 = vmatmul.bf16.gmra.mxu1 %v481_v63 }
  0x7b   : > { %725 = vmatmul.bf16.gmra.mxu2 %v480_v62  ;;  %744 = vmatmul.bf16.gmra.mxu3 %v481_v63 }
  0xe6   : > { %v683_v1 = vpop.f32.mrf.mxu0  ;;  %v702_v2 = vpop.f32.mrf.mxu1 }
  0xe7   : > { %v2818_v3 = vadd.f32 %v702_v2, %v683_v1 }
  0xee   : > { %v685_v4 = vpop.f32.mrf.mxu0  ;;  %v721_v5 = vpop.f32.mrf.mxu2 }
  0xef   : > { %v740_v6 = vpop.f32.mrf.mxu3  ;;  %v704_v7 = vpop.f32.mrf.mxu1 }
  0xf0   : > { %v2820_v8 = vadd.f32 %v740_v6, %v721_v5  ;;  %v2822_v9 = vadd.f32 %v704_v7, %v685_v4 }
  0xf6   : > { %v688_v10 = vpop.f32.mrf.mxu0  ;;  %v723_v12 = vpop.f32.mrf.mxu2 }
  0xf7   : > { %v742_v13 = vpop.f32.mrf.mxu3  ;;  %v707_v14 = vpop.f32.mrf.mxu1 }
  0xf8   : > { %v2824_v15 = vadd.f32 %v742_v13, %v723_v12  ;;  %v2826_v19 = vadd.f32 %v707_v14, %v688_v10 }
  0xfe   : > { %v690_v20 = vpop.f32.mrf.mxu0  ;;  %v726_v21 = vpop.f32.mrf.mxu2 }
  0xff   : > { %v745_v22 = vpop.f32.mrf.mxu3  ;;  %v709_v23 = vpop.f32.mrf.mxu1 }
 0x100   : > { %v2828_v24 = vadd.f32 %v745_v22, %v726_v21  ;;  %v2830_v25 = vadd.f32 %v709_v23, %v690_v20 }
 0x104   : > { %753 = sbr.rel (%p1830_p1) target bundleno = 302 (0x12e), region = 84 }
 0x106   : > { %v728_v26 = vpop.f32.mrf.mxu2 }
 0x107   : > { %v747_v27 = vpop.f32.mrf.mxu3 }
 0x108   : > { %v2832_v28 = vadd.f32 %v747_v27, %v728_v26 }
 0x109   : > { %757 = sbr.rel (%p1831_p3) target bundleno = 273 (0x111), region = 88 }
 0x10e   : > { %v2580_v29 = vmov 0.0  }
 0x10f   : > { %758 = vst [vmem:[#allocation2] sm:$0xff] %v2580_v29 }
 0x110   : > { %759 = vst [vmem:[#allocation2 + $0x8] sm:$0xff] %v2580_v29 }
 0x111 PF: > { %v760_v30 = vmul.f32 %v2802_v11, %v2818_v3  ;;  %v761_v31 = vmul.f32 %v2802_v11, %v2820_v8  ;;  %v762_v32 = vmul.f32 %v2804_v16, %v2822_v9  ;;  %v763_v33 = vmul.f32 %v2804_v16, %v2824_v15 }
 0x112   : > { %v764_v34 = vmul.f32 %v2806_v17, %v2826_v19  ;;  %v765_v35 = vmul.f32 %v2806_v17, %v2828_v24  ;;  %v766_v36 = vmul.f32 %v2808_v18, %v2830_v25  ;;  %v767_v37 = vmul.f32 %v2808_v18, %v2832_v28 }
 0x113   : > { %v769_v38 = vadd.f32 %v762_v32, %v760_v30  ;;  %v778_v39 = vadd.f32 %v763_v33, %v761_v31  ;;  %v802_v40 = vmul.f32 %v760_v30, %v2818_v3  ;;  %v803_v41 = vmul.f32 %v761_v31, %v2820_v8 }
 0x114   : > { %v804_v42 = vmul.f32 %v762_v32, %v2822_v9  ;;  %v805_v43 = vmul.f32 %v763_v33, %v2824_v15  ;;  %v806_v46 = vmul.f32 %v764_v34, %v2826_v19  ;;  %v807_v47 = vmul.f32 %v765_v35, %v2828_v24 }
 0x115   : > { %v770_v44 = vadd.f32 %v769_v38, %v764_v34  ;;  %v779_v45 = vadd.f32 %v778_v39, %v765_v35  ;;  %v808_v48 = vmul.f32 %v766_v36, %v2830_v25  ;;  %v809_v49 = vmul.f32 %v767_v37, %v2832_v28 }
 0x116   : > { %v810_v50 = vadd.f32 %v804_v42, %v802_v40  ;;  %v819_v51 = vadd.f32 %v805_v43, %v803_v41  ;;  %vm790_vm4 = vcmask 1040384   ;;  %vm796_vm5 = vcmp.lt.s32.totalorder %v448_v0, 256 }
 0x117   : > { %v771_v52 = vadd.f32 %v770_v44, %v766_v36  ;;  %v780_v53 = vadd.f32 %v779_v45, %v767_v37  ;;  %v768_v29 = vld [vmem:[#allocation2] ss:$8 sm:$0x3]  ;;  %v801_v35 = vld [vmem:[#allocation2 + $0x1] ss:$8 sm:$0x3] }
 0x118   : > { %v811_v54 = vadd.f32 %v810_v50, %v806_v46  ;;  %v820_v55 = vadd.f32 %v819_v51, %v807_v47 }
 0x119   : > { %v772_v56 = vrot.slane %v771_v52, 4  ;;  %v781_v57 = vrot.slane %v780_v53, 4 }
 0x11a   : > { %v812_v58 = vadd.f32 %v811_v54, %v808_v48  ;;  %v821_v59 = vadd.f32 %v820_v55, %v809_v49 }
 0x11b   : > { %v773_v60 = vadd.f32 %v772_v56, %v771_v52  ;;  %v782_v61 = vadd.f32 %v781_v57, %v780_v53 }
 0x11c   : > { %v813_v62 = vrot.slane %v812_v58, 4  ;;  %v822_v63 = vrot.slane %v821_v59, 4 }
 0x11d   : > { %v774_v1 = vrot.slane %v773_v60, 2  ;;  %v783_v2 = vrot.slane %v782_v61, 2 }
 0x11e   : > { %v814_v4 = vadd.f32 %v813_v62, %v812_v58  ;;  %v823_v5 = vadd.f32 %v822_v63, %v821_v59 }
 0x11f   : > { %v775_v6 = vadd.f32 %v774_v1, %v773_v60  ;;  %v784_v7 = vadd.f32 %v783_v2, %v782_v61 }
 0x120   : > { %v815_v10 = vrot.slane %v814_v4, 2  ;;  %v824_v12 = vrot.slane %v823_v5, 2 }
 0x121   : > { %v776_v13 = vrot.slane %v775_v6, 1  ;;  %v785_v14 = vrot.slane %v784_v7, 1 }
 0x122   : > { %v816_v20 = vadd.f32 %v815_v10, %v814_v4  ;;  %v825_v21 = vadd.f32 %v824_v12, %v823_v5 }
 0x123   : > { %v777_v22 = vadd.f32 %v776_v13, %v775_v6  ;;  %v786_v23 = vadd.f32 %v785_v14, %v784_v7 }
 0x124   : > { %v817_v26 = vrot.slane %v816_v20, 1  ;;  %v826_v27 = vrot.slane %v825_v21, 1 }
 0x125   : > { %v789_v30 = vrot.slane %v786_v23, 7 }
 0x126   : > { %v818_v31 = vadd.f32 %v817_v26, %v816_v20  ;;  %v827_v32 = vadd.f32 %v826_v27, %v825_v21 }
 0x127   : > { %v791_v33 = vsel %vm790_vm4, %v777_v22, %v789_v30 }
 0x128   : > { %v793_v34 = vadd.f32 %v791_v33, %v768_v29  ;;  %v830_v36 = vrot.slane %v827_v32, 7 }
 0x12a   : > { %798 = vst.msk [vmem:[#allocation2] ss:$8 sm:$0x3] %vm796_vm5, %v793_v34  ;;  %v831_v37 = vsel %vm790_vm4, %v818_v31, %v830_v36 }
 0x12b   : > { %v833_v38 = vadd.f32 %v831_v37, %v801_v35 }
 0x12d   : > { %834 = vst.msk [vmem:[#allocation2 + $0x1] ss:$8 sm:$0x3] %vm796_vm5, %v833_v38 }
 0x12e PF: > { %p1832_p8 = scmp.lt.s32.totalorder %s2554_s13, 1 }
 0x12f   : > { %p840_p9 = scmp.eq.s32.totalorder (!%p1832_p8), %s2554_s13, 1  ;;  %p841_p10 = scmp.eq.s32.totalorder (!%p1832_p8), %s2550_s12, 0 }
 0x130   : > { %839 = sbr.rel (%p1832_p8) target bundleno = 797 (0x31d), region = 92 }
 0x131   : > { %p842_p11 = pnand (!%p1832_p8), %p841_p10, %p840_p9 }
 0x135   : > { %845 = sbr.rel (%p842_p11) target bundleno = 350 (0x15e), region = 96 }
 0x13a   : > { %v846_v39 = vld [vmem:[#allocation2] ss:$8 sm:$0x3]  ;;  %v849_v40 = vld [vmem:[#allocation2 + $0x1] ss:$8 sm:$0x3] }
 0x13b   : > { %v847_v41 = vmul.f32 0.013888889, %v846_v39  ;;  %v850_v42 = vmul.f32 0.013888889, %v849_v40  ;;  %v854_v52 = vld [vmem:[#allocation8] sm:$0x3] }
 0x13c   : > { %vm869_vm9 = vcmp.lt.s32.totalorder %v448_v0, 256  ;;  %v874_v56 = vld [vmem:[%s2991_s3] sm:$0x3] }
 0x13d   : > { %v851_v43 = vmul.f32 %v847_v41, %v847_v41 }
 0x13f   : > { %v852_v44 = vsub.f32 %v850_v42, %v851_v43 }
 0x141   : > { %v853_v45 = vmax.f32 %v852_v44, 0.0 }
 0x143   : > { %v855_v46 = vadd.f32 1e-05, %v853_v45 }
 0x145   : > { %2271 = vrsqrt.f32 %v855_v46  ;;  %vm862_vm6 = vweird.f32 %v855_v46 }
 0x14b   : > { %v2272_v47 = vpop.eup %2271 }
 0x14c   : > { %v857_v48 = vmul.f32 %v2272_v47, %v855_v46  ;;  %vm863_vm7 = vweird.f32 %v2272_v47 }
 0x14d   : > { %vm864_vm8 = vmor %vm862_vm6, %vm863_vm7 }
 0x14e   : > { %v858_v49 = vmul.f32 %v2272_v47, %v857_v48 }
 0x150   : > { %v859_v50 = vmul.f32 0.5, %v858_v49 }
 0x152   : > { %v860_v51 = vsub.f32 1.5, %v859_v50 }
 0x154   : > { %v861_v53 = vmul.f32 %v2272_v47, %v860_v51 }
 0x156   : > { %v865_v54 = vsel %vm864_vm8, %v2272_v47, %v861_v53 }
 0x157   : > { %v866_v55 = vmul.f32 %v865_v54, %v854_v52 }
 0x159   : > { %872 = vst.msk [vmem:[#allocation2 + $0x4] ss:$8 sm:$0x3] %vm869_vm9, %v866_v55  ;;  %v875_v57 = vmul.f32 %v866_v55, %v847_v41 }
 0x15b   : > { %v876_v58 = vsub.f32 %v874_v56, %v875_v57 }
 0x15d   : > { %878 = vst.msk [vmem:[#allocation2 + $0x5] ss:$8 sm:$0x3] %vm869_vm9, %v876_v58 }
 0x15e PF: > { %v1891_v59 = vld [vmem:[#allocation9 + $0x70] sm:$0xf]  ;;  %v2082_v60 = vld [vmem:[#allocation9 + $0x74] sm:$0xf0]  ;;  %v2081_v1 = vld [vmem:[#allocation9 + $0x74] sm:$0xf] }
 0x15f   : > { %v1955_v61 = vld [vmem:[#allocation9 + $0xf0] sm:$0xf]  ;;  %v1892_v62 = vor.u32 %v2082_v60, %v1891_v59  ;;  %v2098_v63 = vld [vmem:[#allocation9 + $0xf4] sm:$0xf0]  ;;  %v1893_v2 = vld [vmem:[#allocation9 + $0x78] sm:$0xf0] }
 0x160   : > { %v1956_v4 = vor.u32 %v2098_v63, %v1955_v61  ;;  %v1896_v5 = vor.u32 %v2081_v1, %v1893_v2  ;;  %v2097_v6 = vld [vmem:[#allocation9 + $0xf4] sm:$0xf]  ;;  %v1957_v7 = vld [vmem:[#allocation9 + $0xf8] sm:$0xf0]  ;;  %v1883_v10 = vld [vmem:[#allocation9 + $0x60] sm:$0xf] }
 0x161   : > { %1114 = vmatpush.bf16.msra.mxu0 %v1892_v62  ;;  %v1960_v12 = vor.u32 %v2097_v6, %v1957_v7  ;;  %v2080_v13 = vld [vmem:[#allocation9 + $0x64] sm:$0xf0]  ;;  %v1947_v14 = vld [vmem:[#allocation9 + $0xe0] sm:$0xf]  ;;  %v2079_v23 = vld [vmem:[#allocation9 + $0x64] sm:$0xf] }
 0x162   : > { %v2096_v20 = vld [vmem:[#allocation9 + $0xe4] sm:$0xf0]  ;;  %1133 = vmatpush.bf16.msra.mxu1 %v1956_v4  ;;  %1152 = vmatpush.bf16.msra.mxu2 %v1896_v5  ;;  %v1884_v21 = vor.u32 %v2080_v13, %v1883_v10  ;;  %v1885_v26 = vld [vmem:[#allocation9 + $0x68] sm:$0xf0]  ;;  %v2095_v27 = vld [vmem:[#allocation9 + $0xe4] sm:$0xf] }
 0x163   : > { %v1948_v22 = vor.u32 %v2096_v20, %v1947_v14  ;;  %1171 = vmatpush.bf16.msra.mxu3 %v1960_v12  ;;  %v1888_v29 = vor.u32 %v2079_v23, %v1885_v26  ;;  %v1949_v30 = vld [vmem:[#allocation9 + $0xe8] sm:$0xf0]  ;;  %v1875_v31 = vld [vmem:[#allocation9 + $0x50] sm:$0xf]  ;;  %v2078_v32 = vld [vmem:[#allocation9 + $0x54] sm:$0xf0] }
 0x164   : > { %v1952_v33 = vor.u32 %v2095_v27, %v1949_v30  ;;  %v1939_v34 = vld [vmem:[#allocation9 + $0xd0] sm:$0xf]  ;;  %v2094_v35 = vld [vmem:[#allocation9 + $0xd4] sm:$0xf0]  ;;  %v2077_v36 = vld [vmem:[#allocation9 + $0x54] sm:$0xf]  ;;  %v1876_v37 = vor.u32 %v2078_v32, %v1875_v31 }
 0x165   : > { %1115 = vmatpush.bf16.msra.mxu0 %v1884_v21  ;;  %v1877_v38 = vld [vmem:[#allocation9 + $0x58] sm:$0xf0]  ;;  %v2093_v39 = vld [vmem:[#allocation9 + $0xd4] sm:$0xf]  ;;  %v1940_v41 = vor.u32 %v2094_v35, %v1939_v34  ;;  %v1867_v43 = vld [vmem:[#allocation9 + $0x40] sm:$0xf] }
 0x166   : > { %v1941_v40 = vld [vmem:[#allocation9 + $0xd8] sm:$0xf0]  ;;  %1134 = vmatpush.bf16.msra.mxu1 %v1948_v22  ;;  %1153 = vmatpush.bf16.msra.mxu2 %v1888_v29  ;;  %v1880_v42 = vor.u32 %v2077_v36, %v1877_v38  ;;  %v2076_v44 = vld [vmem:[#allocation9 + $0x44] sm:$0xf0]  ;;  %v1931_v45 = vld [vmem:[#allocation9 + $0xc0] sm:$0xf] }
 0x167   : > { %1172 = vmatpush.bf16.msra.mxu3 %v1952_v33  ;;  %v1944_v46 = vor.u32 %v2093_v39, %v1941_v40  ;;  %v2092_v47 = vld [vmem:[#allocation9 + $0xc4] sm:$0xf0]  ;;  %v2075_v48 = vld [vmem:[#allocation9 + $0x44] sm:$0xf]  ;;  %v1869_v49 = vld [vmem:[#allocation9 + $0x48] sm:$0xf0]  ;;  %v1868_v52 = vor.u32 %v2076_v44, %v1867_v43 }
 0x168   : > { %v2091_v50 = vld [vmem:[#allocation9 + $0xc4] sm:$0xf]  ;;  %v1933_v51 = vld [vmem:[#allocation9 + $0xc8] sm:$0xf0]  ;;  %v1932_v53 = vor.u32 %v2092_v47, %v1931_v45  ;;  %v1872_v54 = vor.u32 %v2075_v48, %v1869_v49  ;;  %v1859_v55 = vld [vmem:[#allocation9 + $0x30] sm:$0xf] }
 0x169   : > { %1116 = vmatpush.bf16.msra.mxu0 %v1876_v37  ;;  %v2074_v56 = vld [vmem:[#allocation9 + $0x34] sm:$0xf0]  ;;  %v1923_v57 = vld [vmem:[#allocation9 + $0xb0] sm:$0xf]  ;;  %v1936_v58 = vor.u32 %v2091_v50, %v1933_v51  ;;  %v2073_v60 = vld [vmem:[#allocation9 + $0x34] sm:$0xf] }
 0x16a   : > { %1135 = vmatpush.bf16.msra.mxu1 %v1940_v41  ;;  %1154 = vmatpush.bf16.msra.mxu2 %v1880_v42  ;;  %v2090_v59 = vld [vmem:[#allocation9 + $0xb4] sm:$0xf0]  ;;  %v1861_v61 = vld [vmem:[#allocation9 + $0x38] sm:$0xf0]  ;;  %v2089_v62 = vld [vmem:[#allocation9 + $0xb4] sm:$0xf]  ;;  %v1860_v1 = vor.u32 %v2074_v56, %v1859_v55 }
 0x16b   : > { %1173 = vmatpush.bf16.msra.mxu3 %v1944_v46  ;;  %v1925_v63 = vld [vmem:[#allocation9 + $0xb8] sm:$0xf0]  ;;  %v1924_v2 = vor.u32 %v2090_v59, %v1923_v57  ;;  %v1864_v4 = vor.u32 %v2073_v60, %v1861_v61  ;;  %v1851_v5 = vld [vmem:[#allocation9 + $0x20] sm:$0xf]  ;;  %v2072_v6 = vld [vmem:[#allocation9 + $0x24] sm:$0xf0] }
 0x16c   : > { %v1915_v7 = vld [vmem:[#allocation9 + $0xa0] sm:$0xf]  ;;  %v1928_v10 = vor.u32 %v2089_v62, %v1925_v63  ;;  %v2088_v12 = vld [vmem:[#allocation9 + $0xa4] sm:$0xf0]  ;;  %v2071_v13 = vld [vmem:[#allocation9 + $0x24] sm:$0xf]  ;;  %v1852_v23 = vor.u32 %v2072_v6, %v1851_v5 }
 0x16d   : > { %1117 = vmatpush.bf16.msra.mxu0 %v1868_v52  ;;  %v1853_v14 = vld [vmem:[#allocation9 + $0x28] sm:$0xf0]  ;;  %v2087_v20 = vld [vmem:[#allocation9 + $0xa4] sm:$0xf]  ;;  %v1843_v22 = vld [vmem:[#allocation9 + $0x10] sm:$0xf]  ;;  %v1916_v30 = vor.u32 %v2088_v12, %v1915_v7 }
 0x16e   : > { %1136 = vmatpush.bf16.msra.mxu1 %v1932_v53  ;;  %1155 = vmatpush.bf16.msra.mxu2 %v1872_v54  ;;  %v1917_v21 = vld [vmem:[#allocation9 + $0xa8] sm:$0xf0]  ;;  %v2070_v26 = vld [vmem:[#allocation9 + $0x14] sm:$0xf0]  ;;  %v1907_v27 = vld [vmem:[#allocation9 + $0x90] sm:$0xf]  ;;  %v1856_v31 = vor.u32 %v2071_v13, %v1853_v14 }
 0x16f   : > { %1174 = vmatpush.bf16.msra.mxu3 %v1936_v58  ;;  %v2086_v29 = vld [vmem:[#allocation9 + $0x94] sm:$0xf0]  ;;  %v2069_v32 = vld [vmem:[#allocation9 + $0x14] sm:$0xf]  ;;  %v1845_v33 = vld [vmem:[#allocation9 + $0x18] sm:$0xf0]  ;;  %v1920_v35 = vor.u32 %v2087_v20, %v1917_v21  ;;  %v1844_v38 = vor.u32 %v2070_v26, %v1843_v22 }
 0x170   : > { %v2085_v34 = vld [vmem:[#allocation9 + $0x94] sm:$0xf]  ;;  %v1909_v36 = vld [vmem:[#allocation9 + $0x98] sm:$0xf0]  ;;  %v1908_v42 = vor.u32 %v2086_v29, %v1907_v27  ;;  %v1848_v43 = vor.u32 %v2069_v32, %v1845_v33  ;;  %v1835_v44 = vld [vmem:[#allocation9] sm:$0xf] }
 0x171   : > { %1118 = vmatpush.bf16.msra.mxu0 %v1860_v1  ;;  %v881_v37 = vld [vmem:[#allocation2 + $0x4] ss:$8 sm:$0x3]  ;;  %v896_v40 = vld [vmem:[#allocation2 + $0x5] ss:$8 sm:$0x3]  ;;  %v1912_v53 = vor.u32 %v2085_v34, %v1909_v36 }
 0x172   : > { %1137 = vmatpush.bf16.msra.mxu1 %v1924_v2  ;;  %1156 = vmatpush.bf16.msra.mxu2 %v1864_v4  ;;  %v883_v39 = vperm.slane %v881_v37, 0  ;;  %v884_v41 = vperm.slane %v881_v37, 1  ;;  %v898_v45 = vperm.slane %v896_v40, 0  ;;  %v899_v46 = vperm.slane %v896_v40, 1  ;;  %v2068_v47 = vld [vmem:[#allocation9 + $0x4] sm:$0xf0] }
 0x173   : > { %1175 = vmatpush.bf16.msra.mxu3 %v1928_v10  ;;  %v1899_v48 = vld [vmem:[#allocation9 + $0x80] sm:$0xf]  ;;  %v2084_v49 = vld [vmem:[#allocation9 + $0x84] sm:$0xf0]  ;;  %v2067_v54 = vld [vmem:[#allocation9 + $0x4] sm:$0xf]  ;;  %v1836_v62 = vor.u32 %v2068_v47, %v1835_v44 }
 0x174   : > { %v887_v50 = vmul.f32 %v883_v39, %v2818_v3  ;;  %v889_v51 = vmul.f32 %v883_v39, %v2822_v9  ;;  %v888_v52 = vmul.f32 %v884_v41, %v2820_v8  ;;  %v1837_v55 = vld [vmem:[#allocation9 + $0x8] sm:$0xf0]  ;;  %v890_v56 = vmul.f32 %v884_v41, %v2824_v15  ;;  %v2083_v57 = vld [vmem:[#allocation9 + $0x84] sm:$0xf]  ;;  %p1961_p12 = scmp.ne.s32.totalorder %s2554_s13, 1 }
 0x175   : > { %1119 = vmatpush.bf16.msra.mxu0 %v1852_v23  ;;  %v1901_v58 = vld [vmem:[#allocation9 + $0x88] sm:$0xf0]  ;;  %v1900_v63 = vor.u32 %v2084_v49, %v1899_v48  ;;  %v1840_v3 = vor.u32 %v2067_v54, %v1837_v55  ;;  %v891_v7 = vmul.f32 %v883_v39, %v2826_v19  ;;  %v893_v10 = vmul.f32 %v883_v39, %v2830_v25 }
 0x176   : > { %1138 = vmatpush.bf16.msra.mxu1 %v1916_v30  ;;  %1157 = vmatpush.bf16.msra.mxu2 %v1856_v31  ;;  %v902_v59 = vadd.f32 %v898_v45, %v887_v50  ;;  %v904_v60 = vadd.f32 %v898_v45, %v889_v51  ;;  %v903_v61 = vadd.f32 %v899_v46, %v888_v52 }
 0x177   : > { %1176 = vmatpush.bf16.msra.mxu3 %v1920_v35  ;;  %v905_v1 = vadd.f32 %v899_v46, %v890_v56  ;;  %v1904_v4 = vor.u32 %v2083_v57, %v1901_v58  ;;  %v892_v12 = vmul.f32 %v884_v41, %v2828_v24  ;;  %v894_v13 = vmul.f32 %v884_v41, %v2832_v28 }
 0x178   : > { %v910_v9 = vmax.f32 %v902_v59, 0.0  ;;  %v912_v8 = vmax.f32 %v904_v60, 0.0  ;;  %v911_v2 = vmax.f32 %v903_v61, 0.0  ;;  %v906_v14 = vadd.f32 %v898_v45, %v891_v7 }
 0x179   : > { %1120 = vmatpush.bf16.msra.mxu0 %v1844_v38  ;;  %v913_v5 = vmax.f32 %v905_v1, 0.0  ;;  %v908_v20 = vadd.f32 %v898_v45, %v893_v10  ;;  %v907_v21 = vadd.f32 %v899_v46, %v892_v12  ;;  %v909_v22 = vadd.f32 %v899_v46, %v894_v13 }
 0x17a   : > { %1139 = vmatpush.bf16.msra.mxu1 %v1908_v42  ;;  %1158 = vmatpush.bf16.msra.mxu2 %v1848_v43  ;;  %v918_v6 = vpack.c.bf16 %v912_v8, %v910_v9  ;;  %v914_v23 = vmax.f32 %v906_v14, 0.0 }
 0x17b   : > { %1177 = vmatpush.bf16.msra.mxu3 %v1912_v53  ;;  %v919_v15 = vpack.c.bf16 %v913_v5, %v911_v2  ;;  %v916_v26 = vmax.f32 %v908_v20, 0.0  ;;  %v915_v27 = vmax.f32 %v907_v21, 0.0  ;;  %v917_v29 = vmax.f32 %v909_v22, 0.0 }
 0x17d   : > { %1121 = vmatpush.bf16.msra.mxu0 %v1836_v62  ;;  %v920_v30 = vpack.c.bf16 %v916_v26, %v914_v23  ;;  %v921_v31 = vpack.c.bf16 %v917_v29, %v915_v27 }
 0x17e   : > { %1140 = vmatpush.bf16.msra.mxu1 %v1900_v63  ;;  %1159 = vmatpush.bf16.msra.mxu2 %v1840_v3 }
 0x17f   : > { %1178 = vmatpush.bf16.msra.mxu3 %v1904_v4 }
 0x180   : > { %1122 = vmatmul.bf16.vlgmr.msra.gmra.mxu0 %v918_v6 }
 0x181   : > { %1141 = vmatmul.bf16.vlgmr.msra.gmra.mxu1 %v919_v15  ;;  %1160 = vmatmul.bf16.vlgmr.msra.gmra.mxu2 %v918_v6 }
 0x182   : > { %1179 = vmatmul.bf16.vlgmr.msra.gmra.mxu3 %v919_v15 }
 0x190   : > { %1127 = vmatmul.bf16.gmra.mxu0 %v920_v30 }
 0x191   : > { %1146 = vmatmul.bf16.gmra.mxu1 %v921_v31  ;;  %1165 = vmatmul.bf16.gmra.mxu2 %v920_v30 }
 0x192   : > { %1184 = vmatmul.bf16.gmra.mxu3 %v921_v31 }
 0x1fd   : > { %v1123_v19 = vpop.f32.mrf.mxu0 }
 0x1fe   : > { %v1142_v25 = vpop.f32.mrf.mxu1 }
 0x1ff   : > { %v2880_v24 = vadd.f32 %v1142_v25, %v1123_v19 }
 0x204   : > { %v1161_v28 = vpop.f32.mrf.mxu2 }
 0x205   : > { %v1180_v32 = vpop.f32.mrf.mxu3  ;;  %v1125_v33 = vpop.f32.mrf.mxu0 }
 0x206   : > { %v2882_v34 = vadd.f32 %v1180_v32, %v1161_v28  ;;  %v1144_v35 = vpop.f32.mrf.mxu1 }
 0x207   : > { %v2884_v36 = vadd.f32 %v1144_v35, %v1125_v33 }
 0x20c   : > { %v1163_v37 = vpop.f32.mrf.mxu2 }
 0x20d   : > { %v1182_v38 = vpop.f32.mrf.mxu3  ;;  %v1128_v39 = vpop.f32.mrf.mxu0 }
 0x20e   : > { %v2886_v40 = vadd.f32 %v1182_v38, %v1163_v37  ;;  %v1147_v41 = vpop.f32.mrf.mxu1 }
 0x20f   : > { %v2888_v42 = vadd.f32 %v1147_v41, %v1128_v39 }
 0x214   : > { %v1166_v43 = vpop.f32.mrf.mxu2 }
 0x215   : > { %v1185_v44 = vpop.f32.mrf.mxu3  ;;  %v1130_v45 = vpop.f32.mrf.mxu0 }
 0x216   : > { %v2890_v46 = vadd.f32 %v1185_v44, %v1166_v43  ;;  %v1149_v47 = vpop.f32.mrf.mxu1 }
 0x217   : > { %v2892_v48 = vadd.f32 %v1149_v47, %v1130_v45 }
 0x21a   : > { %1192 = sbr.rel (%p1961_p12) target bundleno = 572 (0x23c), region = 100 }
 0x21c   : > { %v1168_v49 = vpop.f32.mrf.mxu2 }
 0x21d   : > { %v1187_v50 = vpop.f32.mrf.mxu3 }
 0x21e   : > { %v2894_v51 = vadd.f32 %v1187_v50, %v1168_v49 }
 0x21f   : > { %v1193_v52 = vmul.f32 %v2802_v11, %v2880_v24  ;;  %v1194_v53 = vmul.f32 %v2802_v11, %v2882_v34  ;;  %v1195_v54 = vmul.f32 %v2804_v16, %v2884_v36  ;;  %v1196_v55 = vmul.f32 %v2804_v16, %v2886_v40  ;;  %v1202_v44 = vld [vmem:[#allocation2 + $0x2] ss:$8 sm:$0x3] }
 0x220   : > { %v1197_v56 = vmul.f32 %v2806_v17, %v2888_v42  ;;  %v1198_v57 = vmul.f32 %v2806_v17, %v2890_v46  ;;  %v1199_v58 = vmul.f32 %v2808_v18, %v2892_v48  ;;  %v1200_v59 = vmul.f32 %v2808_v18, %v2894_v51 }
 0x221   : > { %v1203_v60 = vadd.f32 %v1195_v54, %v1193_v52  ;;  %v1212_v11 = vadd.f32 %v1196_v55, %v1194_v53  ;;  %v1236_v61 = vmul.f32 %v1193_v52, %v2880_v24  ;;  %v1237_v62 = vmul.f32 %v1194_v53, %v2882_v34  ;;  %v1235_v53 = vld [vmem:[#allocation2 + $0x3] ss:$8 sm:$0x3] }
 0x222   : > { %v1238_v16 = vmul.f32 %v1195_v54, %v2884_v36  ;;  %v1239_v63 = vmul.f32 %v1196_v55, %v2886_v40  ;;  %v1240_v17 = vmul.f32 %v1197_v56, %v2888_v42  ;;  %v1241_v9 = vmul.f32 %v1198_v57, %v2890_v46 }
 0x223   : > { %v1204_v1 = vadd.f32 %v1203_v60, %v1197_v56  ;;  %v1213_v3 = vadd.f32 %v1212_v11, %v1198_v57  ;;  %v1242_v8 = vmul.f32 %v1199_v58, %v2892_v48  ;;  %v1243_v18 = vmul.f32 %v1200_v59, %v2894_v51 }
 0x224   : > { %v1244_v2 = vadd.f32 %v1238_v16, %v1236_v61  ;;  %v1253_v4 = vadd.f32 %v1239_v63, %v1237_v62  ;;  %vm1224_vm10 = vcmask 1040384   ;;  %vm1230_vm11 = vcmp.lt.s32.totalorder %v448_v0, 256 }
 0x225   : > { %v1205_v5 = vadd.f32 %v1204_v1, %v1199_v58  ;;  %v1214_v6 = vadd.f32 %v1213_v3, %v1200_v59 }
 0x226   : > { %v1245_v15 = vadd.f32 %v1244_v2, %v1240_v17  ;;  %v1254_v7 = vadd.f32 %v1253_v4, %v1241_v9 }
 0x227   : > { %v1206_v10 = vrot.slane %v1205_v5, 4  ;;  %v1215_v12 = vrot.slane %v1214_v6, 4 }
 0x228   : > { %v1246_v13 = vadd.f32 %v1245_v15, %v1242_v8  ;;  %v1255_v14 = vadd.f32 %v1254_v7, %v1243_v18 }
 0x229   : > { %v1207_v20 = vadd.f32 %v1206_v10, %v1205_v5  ;;  %v1216_v21 = vadd.f32 %v1215_v12, %v1214_v6 }
 0x22a   : > { %v1247_v22 = vrot.slane %v1246_v13, 4  ;;  %v1256_v23 = vrot.slane %v1255_v14, 4 }
 0x22b   : > { %v1208_v26 = vrot.slane %v1207_v20, 2  ;;  %v1217_v27 = vrot.slane %v1216_v21, 2 }
 0x22c   : > { %v1248_v29 = vadd.f32 %v1247_v22, %v1246_v13  ;;  %v1257_v30 = vadd.f32 %v1256_v23, %v1255_v14 }
 0x22d   : > { %v1209_v31 = vadd.f32 %v1208_v26, %v1207_v20  ;;  %v1218_v19 = vadd.f32 %v1217_v27, %v1216_v21 }
 0x22e   : > { %v1249_v25 = vrot.slane %v1248_v29, 2  ;;  %v1258_v28 = vrot.slane %v1257_v30, 2 }
 0x22f   : > { %v1210_v32 = vrot.slane %v1209_v31, 1  ;;  %v1219_v33 = vrot.slane %v1218_v19, 1 }
 0x230   : > { %v1250_v35 = vadd.f32 %v1249_v25, %v1248_v29  ;;  %v1259_v37 = vadd.f32 %v1258_v28, %v1257_v30 }
 0x231   : > { %v1211_v38 = vadd.f32 %v1210_v32, %v1209_v31  ;;  %v1220_v39 = vadd.f32 %v1219_v33, %v1218_v19 }
 0x232   : > { %v1251_v41 = vrot.slane %v1250_v35, 1  ;;  %v1260_v43 = vrot.slane %v1259_v37, 1 }
 0x233   : > { %v1223_v45 = vrot.slane %v1220_v39, 7 }
 0x234   : > { %v1252_v47 = vadd.f32 %v1251_v41, %v1250_v35  ;;  %v1261_v49 = vadd.f32 %v1260_v43, %v1259_v37 }
 0x235   : > { %v1225_v50 = vsel %vm1224_vm10, %v1211_v38, %v1223_v45 }
 0x236   : > { %v1227_v52 = vadd.f32 %v1225_v50, %v1202_v44  ;;  %v1264_v54 = vrot.slane %v1261_v49, 7 }
 0x238   : > { %1232 = vst.msk [vmem:[#allocation2 + $0x2] ss:$8 sm:$0x3] %vm1230_vm11, %v1227_v52  ;;  %v1265_v55 = vsel %vm1224_vm10, %v1252_v47, %v1264_v54 }
 0x239   : > { %v1267_v56 = vadd.f32 %v1265_v55, %v1235_v53 }
 0x23b   : > { %1268 = vst.msk [vmem:[#allocation2 + $0x3] ss:$8 sm:$0x3] %vm1230_vm11, %v1267_v56 }
 0x23c PF: > { %p1962_p13 = scmp.ne.s32.totalorder %s2554_s13, 2 }
 0x23d   : > { %p1963_p0 = scmp.ne.s32.totalorder (!%p1962_p13), %s2550_s12, 0 }
 0x23e   : > { %1273 = sbr.rel (%p1962_p13) target bundleno = 797 (0x31d), region = 104 }
 0x243   : > { %1276 = sbr.rel (%p1963_p0) target bundleno = 620 (0x26c), region = 108  ;;  %s3022_s17 = sld [smem:[#allocation24_spill]] (!%p1963_p0) }
 0x248   : > { %v1278_v57 = vld [vmem:[#allocation2 + $0x2] ss:$8 sm:$0x3]  ;;  %v1281_v58 = vld [vmem:[#allocation2 + $0x3] ss:$8 sm:$0x3] }
 0x249   : > { %v1279_v59 = vmul.f32 0.013888889, %v1278_v57  ;;  %v1282_v60 = vmul.f32 0.013888889, %v1281_v58  ;;  %v1286_v8 = vld [vmem:[%s3022_s17] sm:$0x3] }
 0x24a   : > { %vm1301_vm15 = vcmp.lt.s32.totalorder %v448_v0, 256  ;;  %v1306_v5 = vld [vmem:[#allocation11] sm:$0x3] }
 0x24b   : > { %v1283_v11 = vmul.f32 %v1279_v59, %v1279_v59 }
 0x24d   : > { %v1284_v61 = vsub.f32 %v1282_v60, %v1283_v11 }
 0x24f   : > { %v1285_v62 = vmax.f32 %v1284_v61, 0.0 }
 0x251   : > { %v1287_v16 = vadd.f32 1e-05, %v1285_v62 }
 0x253   : > { %2273 = vrsqrt.f32 %v1287_v16  ;;  %vm1294_vm12 = vweird.f32 %v1287_v16 }
 0x259   : > { %v2274_v63 = vpop.eup %2273 }
 0x25a   : > { %v1289_v1 = vmul.f32 %v2274_v63, %v1287_v16  ;;  %vm1295_vm13 = vweird.f32 %v2274_v63 }
 0x25b   : > { %vm1296_vm14 = vmor %vm1294_vm12, %vm1295_vm13 }
 0x25c   : > { %v1290_v3 = vmul.f32 %v2274_v63, %v1289_v1 }
 0x25e   : > { %v1291_v17 = vmul.f32 0.5, %v1290_v3 }
 0x260   : > { %v1292_v9 = vsub.f32 1.5, %v1291_v17 }
 0x262   : > { %v1293_v18 = vmul.f32 %v2274_v63, %v1292_v9 }
 0x264   : > { %v1297_v2 = vsel %vm1296_vm14, %v2274_v63, %v1293_v18 }
 0x265   : > { %v1298_v4 = vmul.f32 %v1297_v2, %v1286_v8 }
 0x267   : > { %1304 = vst.msk [vmem:[#allocation2 + $0x6] ss:$8 sm:$0x3] %vm1301_vm15, %v1298_v4  ;;  %v1307_v6 = vmul.f32 %v1298_v4, %v1279_v59 }
 0x269   : > { %v1308_v15 = vsub.f32 %v1306_v5, %v1307_v6 }
 0x26b   : > { %1310 = vst.msk [vmem:[#allocation2 + $0x7] ss:$8 sm:$0x3] %vm1301_vm15, %v1308_v15 }
 0x26c PF: > { %v2106_v7 = vld [vmem:[#allocation12 + $0x38] sm:$0xff]  ;;  %v2105_v12 = vld [vmem:[#allocation12 + $0x30] sm:$0xff]  ;;  %v2104_v14 = vld [vmem:[#allocation12 + $0x28] sm:$0xff]  ;;  %s3023_s4 = sld [smem:[#allocation27_spill]] }
 0x26d   : > { %v2114_v10 = vld [vmem:[#allocation12 + $0x78] sm:$0xff]  ;;  %1486 = vmatpush.bf16.msra.mxu0 %v2106_v7  ;;  %2116 = vmatpush.bf16.msra.mxu2 %v2106_v7  ;;  %v2113_v13 = vld [vmem:[#allocation12 + $0x70] sm:$0xff]  ;;  %v2112_v0 = vld [vmem:[#allocation12 + $0x68] sm:$0xff] }
 0x26e   : > { %1505 = vmatpush.bf16.msra.mxu1 %v2114_v10  ;;  %2124 = vmatpush.bf16.msra.mxu3 %v2114_v10  ;;  %v1313_v20 = vld [vmem:[#allocation2 + $0x6] ss:$8 sm:$0x3]  ;;  %v2103_v21 = vld [vmem:[#allocation12 + $0x20] sm:$0xff] }
 0x26f   : > { %v2111_v22 = vld [vmem:[#allocation12 + $0x60] sm:$0xff]  ;;  %v1315_v23 = vperm.slane %v1313_v20, 0  ;;  %v1316_v27 = vperm.slane %v1313_v20, 1  ;;  %v2102_v29 = vld [vmem:[#allocation12 + $0x18] sm:$0xff]  ;;  %v2101_v37 = vld [vmem:[#allocation12 + $0x10] sm:$0xff] }
 0x270   : > { %v2110_v30 = vld [vmem:[#allocation12 + $0x58] sm:$0xff]  ;;  %v2099_v53 = vld [vmem:[#allocation12] sm:$0xff] }
 0x271   : > { %1487 = vmatpush.bf16.msra.mxu0 %v2105_v12  ;;  %2117 = vmatpush.bf16.msra.mxu2 %v2105_v12  ;;  %v1319_v31 = vmul.f32 %v1315_v23, %v2880_v24  ;;  %v1321_v28 = vmul.f32 %v1315_v23, %v2884_v36  ;;  %v1323_v32 = vmul.f32 %v1315_v23, %v2888_v42  ;;  %v2109_v24 = vld [vmem:[#allocation12 + $0x50] sm:$0xff]  ;;  %v2107_v58 = vld [vmem:[#allocation12 + $0x40] sm:$0xff] }
 0x272   : > { %1506 = vmatpush.bf16.msra.mxu1 %v2113_v13  ;;  %2125 = vmatpush.bf16.msra.mxu3 %v2113_v13  ;;  %v1328_v26 = vld [vmem:[#allocation2 + $0x7] ss:$8 sm:$0x3]  ;;  %v1325_v33 = vmul.f32 %v1315_v23, %v2892_v48  ;;  %v1320_v35 = vmul.f32 %v1316_v27, %v2882_v34  ;;  %v1322_v38 = vmul.f32 %v1316_v27, %v2886_v40  ;;  %v2100_v34 = vld [vmem:[#allocation12 + $0x8] sm:$0xff] }
 0x273   : > { %v1330_v19 = vperm.slane %v1328_v26, 0  ;;  %v1331_v25 = vperm.slane %v1328_v26, 1  ;;  %v1324_v39 = vmul.f32 %v1316_v27, %v2890_v46  ;;  %v1326_v41 = vmul.f32 %v1316_v27, %v2894_v51  ;;  %v2108_v40 = vld [vmem:[#allocation12 + $0x48] sm:$0xff] }
 0x274   : > { %v2275_v62 = vld [vmem:[%s3023_s4] ss:$0 sm:$0xff] }
 0x275   : > { %1488 = vmatpush.bf16.msra.mxu0 %v2104_v14  ;;  %2118 = vmatpush.bf16.msra.mxu2 %v2104_v14  ;;  %v1334_v43 = vadd.f32 %v1330_v19, %v1319_v31  ;;  %v1336_v36 = vadd.f32 %v1330_v19, %v1321_v28  ;;  %v1338_v44 = vadd.f32 %v1330_v19, %v1323_v32 }
 0x276   : > { %1507 = vmatpush.bf16.msra.mxu1 %v2112_v0  ;;  %2126 = vmatpush.bf16.msra.mxu3 %v2112_v0  ;;  %v1340_v42 = vadd.f32 %v1330_v19, %v1325_v33  ;;  %v1335_v45 = vadd.f32 %v1331_v25, %v1320_v35  ;;  %v1337_v48 = vadd.f32 %v1331_v25, %v1322_v38 }
 0x277   : > { %v1339_v47 = vadd.f32 %v1331_v25, %v1324_v39  ;;  %v1341_v49 = vadd.f32 %v1331_v25, %v1326_v41  ;;  %v1342_v46 = vmax.f32 %v1334_v43, 0.0  ;;  %v1344_v50 = vmax.f32 %v1336_v36, 0.0 }
 0x278   : > { %v1346_v51 = vmax.f32 %v1338_v44, 0.0  ;;  %v1348_v52 = vmax.f32 %v1340_v42, 0.0  ;;  %v1343_v54 = vmax.f32 %v1335_v45, 0.0  ;;  %v1345_v55 = vmax.f32 %v1337_v48, 0.0 }
 0x279   : > { %1489 = vmatpush.bf16.msra.mxu0 %v2103_v21  ;;  %2119 = vmatpush.bf16.msra.mxu2 %v2103_v21  ;;  %v1347_v56 = vmax.f32 %v1339_v47, 0.0  ;;  %v1349_v57 = vmax.f32 %v1341_v49, 0.0  ;;  %v1350_v59 = vpack.c.bf16 %v1344_v50, %v1342_v46 }
 0x27a   : > { %1508 = vmatpush.bf16.msra.mxu1 %v2111_v22  ;;  %2127 = vmatpush.bf16.msra.mxu3 %v2111_v22  ;;  %v1352_v60 = vpack.c.bf16 %v1348_v52, %v1346_v51  ;;  %v1351_v11 = vpack.c.bf16 %v1345_v55, %v1343_v54 }
 0x27b   : > { %v1353_v61 = vpack.c.bf16 %v1349_v57, %v1347_v56 }
 0x27d   : > { %1490 = vmatpush.bf16.msra.mxu0 %v2102_v29  ;;  %2120 = vmatpush.bf16.msra.mxu2 %v2102_v29 }
 0x27e   : > { %1509 = vmatpush.bf16.msra.mxu1 %v2110_v30  ;;  %2128 = vmatpush.bf16.msra.mxu3 %v2110_v30 }
 0x281   : > { %1491 = vmatpush.bf16.msra.mxu0 %v2101_v37  ;;  %2121 = vmatpush.bf16.msra.mxu2 %v2101_v37 }
 0x282   : > { %1510 = vmatpush.bf16.msra.mxu1 %v2109_v24  ;;  %2129 = vmatpush.bf16.msra.mxu3 %v2109_v24 }
 0x285   : > { %1492 = vmatpush.bf16.msra.mxu0 %v2100_v34  ;;  %2122 = vmatpush.bf16.msra.mxu2 %v2100_v34 }
 0x286   : > { %1511 = vmatpush.bf16.msra.mxu1 %v2108_v40  ;;  %2130 = vmatpush.bf16.msra.mxu3 %v2108_v40 }
 0x289   : > { %1493 = vmatpush.bf16.msra.mxu0 %v2099_v53  ;;  %2123 = vmatpush.bf16.msra.mxu2 %v2099_v53 }
 0x28a   : > { %1512 = vmatpush.bf16.msra.mxu1 %v2107_v58  ;;  %2131 = vmatpush.bf16.msra.mxu3 %v2107_v58 }
 0x28c   : > { %1494 = vmatmul.bf16.vlgmr.msra.gmra.mxu0 %v1350_v59  ;;  %1499 = vmatmul.bf16.vlgmr.msra.gmra.mxu2 %v1352_v60 }
 0x28d   : > { %1513 = vmatmul.bf16.vlgmr.msra.gmra.mxu1 %v1351_v11  ;;  %1518 = vmatmul.bf16.vlgmr.msra.gmra.mxu3 %v1353_v61 }
 0x309   : > { %v1495_v16 = vpop.f32.mrf.mxu0 }
 0x30a   : > { %v1496_v63 = vadd.f32 %v2275_v62, %v1495_v16  ;;  %v1514_v1 = vpop.f32.mrf.mxu1 }
 0x30c   : > { %v1515_v3 = vadd.f32 %v1514_v1, %v1496_v63 }
 0x30e   : > { %1524 = vst [vmem:[%s2836_s7] sm:$0xff] %v1515_v3 }
 0x30f   : > { %v1500_v17 = vpop.f32.mrf.mxu2 }
 0x310   : > { %v1501_v9 = vadd.f32 %v2275_v62, %v1500_v17  ;;  %v1519_v8 = vpop.f32.mrf.mxu3 }
 0x311   : > { %v1497_v18 = vpop.f32.mrf.mxu0 }
 0x312   : > { %v1520_v2 = vadd.f32 %v1519_v8, %v1501_v9  ;;  %v1498_v4 = vadd.f32 %v2275_v62, %v1497_v18  ;;  %v1516_v5 = vpop.f32.mrf.mxu1 }
 0x314   : > { %1526 = vst [vmem:[%s2836_s7 + $0x10] sm:$0xff] %v1520_v2  ;;  %v1517_v6 = vadd.f32 %v1516_v5, %v1498_v4 }
 0x316   : > { %1525 = vst [vmem:[%s2836_s7 + $0x8] sm:$0xff] %v1517_v6 }
 0x317   : > { %v1502_v15 = vpop.f32.mrf.mxu2 }
 0x318   : > { %v1503_v7 = vadd.f32 %v2275_v62, %v1502_v15  ;;  %v1521_v10 = vpop.f32.mrf.mxu3 }
 0x31a   : > { %v1522_v12 = vadd.f32 %v1521_v10, %v1503_v7 }
 0x31c   : > { %1527 = vst [vmem:[%s2836_s7 + $0x18] sm:$0xff] %v1522_v12 }
 0x31d PF: > { %s3024_s19 = sld [smem:[#allocation28_spill]]  ;;  %s1541_s9 = sshll.u32 %s2836_s7, 4  ;;  %s1542_s9 = int_to_ptr.vmem [resolvable:$true] %s1541_s9 }
 0x31e   : > { %s1529_s2 = scalar_lea.sflag [#allocation5], %s2775_s23 }
 0x323   : > { %s1540_s28 = scalar_lea.hbm %s3024_s19, %s1697_s6  ;;  %s2476_s26 = scalar_lea.hbm %s3024_s19, 96 }
 0x324   : > { %s1543_s5 = sshll.u32 %s1540_s28, 4  ;;  %s1544_s5 = int_to_ptr.hbm [resolvable:$true] %s1543_s5 }
 0x325   : > { %s2470_s18 = sshra.s32 %s1544_s5, 4  ;;  %s2471_s18 = int_to_ptr.hbm [resolvable:$true] %s2470_s18 }
 0x326   : > { %s2472_s22 = scalar_lea.hbm %s2471_s18, 32  ;;  %p2477_p1 = scmp.lt.s32.totalorder %s2471_s18, %s3024_s19 }
 0x327   : > { %p2473_p4 = scmp.ne.s32.totalorder %s2471_s18, %s2472_s22  ;;  %p2478_p3 = scmp.lt.s32.totalorder %s2476_s26, %s2472_s22 }
 0x329   : > { %p2474_p5 = pnand %p2473_p4, %p2756_p2  ;;  %p2479_p8 = por %p2478_p3, %p2477_p1 }
 0x32b   : > { %p2475_p7 = pneg %p2474_p5 }
 0x32d   : > { %p2480_p9 = pnand %p2479_p8, %p2475_p7 }
 0x32f   : > { %2483 = shalt.err (!%p2480_p9)
}
 0x330   : > { %s2581_s23 = smov 128   ;;  %s2582_s6 = smov 8  }
 0x331   : > { %2154 = dma.vmem_to_hbm [thread:$0]  (%p2756_p2), %s1542_s9, 512, %s1544_s5, %s1529_s2, %s2581_s23, %s2581_s23, %s2582_s6  }
 0x332 PF: > { %p2191_p10 = scmp.ge.s32.totalorder %s2566_s16, 2  ;;  %s1558_s7 = sand.u32 1, %s2538_s30  }
 0x333   : > { %s1559_s29 = scalar_lea.sflag [#allocation5], %s1558_s7 }
 0x334   : > { %p2177_p11 = pnand %p2191_p10, %p2763_p6 }
 0x336   : > { %p2178_p12 = pneg %p2177_p11 }
 0x338   : > { %2533 = dma.done.wait (%p2178_p12), %s1559_s29, 512  }
 0x339   : > { %2535 = vsyncadd (%p2178_p12), %s1559_s29, 4294966784  ;;  %s28_s16 = sadd.s32 1, %s2566_s16   ;;  %s3025_s21 = sld [smem:[#allocation20_spill]] }
 0x33a   : > { %p25_p13 = scmp.ge.s32.totalorder %s28_s16, 11   ;;  %s3026_s30 = smov %s2542_s10 }
 0x33b   : > { %s3027_s10 = smov %s2546_s11  ;;  %s3028_s11 = smov %s2745_s1 }
 0x33c   : > { %s3029_s12 = smov %s2558_s14  ;;  %s3030_s13 = smov %s2562_s15 }
 0x33d   : > { %s3031_s14 = smov %s3034_s20  ;;  %27 = sbr.rel (!%p25_p13) target bundleno = 19 (0x13), region = 163 }
 0x33f   : > { %s3032_s15 = smov %s3025_s21 }
 0x342   :  { %1565 = vsyncpa [#allocation4], 1 }
 0x343   :  { %1567 = vsyncpa [#allocation4 + $0x1], 1 }
 0x344   :  { %1568 = vsyncpa [#allocation7], 1 }
 0x345   :  { %1569 = vsyncpa [#allocation10], 1 }
 0x346   :  { %1570 = vsyncpa [#allocation13], 1 }
 0x347   :  { %1571 = vsyncpa [#allocation5], 1 }
 0x348   :  { %1573 = vsyncpa [#allocation5 + $0x1], 1 }

</bundles_post_ra>
